<compile_context>
chip_gen: v5e
topology: v5e:2x2
jax: 0.10.0
libtpu: 0.0.40
codegen_flags: <defaults>
</compile_context>

<pallas_src>
import functools

import jax
import jax.numpy as jnp
from jax.experimental import pallas as pl
from jax.experimental.pallas import tpu as pltpu

HIDDEN = 256


def _device_kind():
    try:
        return jax.devices()[0].device_kind.lower()
    except Exception:  # no backend available at import time
        return ""


_DEVICE_KIND = _device_kind()
# bf16 VPU/EUP exists on v6e / v7x; v5e (and older) lack it, so keep the
# transcendental chain in f32 there (generation dispatch per perf review).
_USE_BF16_ACT = any(tag in _DEVICE_KIND for tag in ("v6", "v7", "7x"))
# v5e's slower MXU already amortizes per-grid-step overhead at ~256-512 rows;
# v6e/v7x want larger tiles (sweep 512-1024 per generation in production).
_TM_MAX = 1024 if _USE_BF16_ACT else 512


def _round_up(v, m):
    return ((v + m - 1) // m) * m


def _pick_tm(n, *, tm_max=None, min_blocks=8):
    """Row-tile selection.

    Goals (perf review):
      * each grid step carries enough MXU work to amortize the ~0.35 us
        per-step pipeline overhead  -> prefer 512-1024 rows on v6e/v7x;
      * the (parallel) grid axis keeps >= `min_blocks` blocks so v7x's two
        TensorCores both get work for mid-sized N;
      * tiny inputs (the demo) clamp to the row count, rounded to the sublane
        granule of 8, so the BlockSpec stays legal.
    """
    if tm_max is None:
        tm_max = _TM_MAX
    tm = _round_up(max(1, pl.cdiv(n, min_blocks)), 256)
    tm = min(tm, tm_max)
    tm = min(tm, _round_up(n, 8))
    return max(8, _round_up(tm, 8))


def _mlp4_kernel(x_ref, w1_ref, b1_ref, w2_ref, b2_ref, w3_ref, b3_ref,
                 w4_ref, b4_ref, o_ref, *, bf16_act):
    """sigmoid(L4(tanh(L3(tanh(L2(tanh(L1(x)))))))) on one (tm, d_in) row tile.

    Matmul operands are bf16 with f32 MXU accumulation.  On v6e/v7x the tanh
    chain runs in bf16 (bf16 EUP + no per-layer cast passes); on v5e it stays
    in f32.  The final sigmoid is f32 either way (output is 1-5 lanes wide).
    """
    x = x_ref[...]

    def dot(a, w):
        return jnp.dot(a, w, preferred_element_type=jnp.float32)

    if bf16_act:
        h = jnp.tanh((dot(x, w1_ref[...]) + b1_ref[...]).astype(jnp.bfloat16))
        h = jnp.tanh((dot(h, w2_ref[...]) + b2_ref[...]).astype(jnp.bfloat16))
        h = jnp.tanh((dot(h, w3_ref[...]) + b3_ref[...]).astype(jnp.bfloat16))
        z = dot(h, w4_ref[...]) + b4_ref[...]
    else:
        h = jnp.tanh(dot(x, w1_ref[...]) + b1_ref[...])
        h = jnp.tanh(dot(h.astype(jnp.bfloat16), w2_ref[...]) + b2_ref[...])
        h = jnp.tanh(dot(h.astype(jnp.bfloat16), w3_ref[...]) + b3_ref[...])
        z = dot(h.astype(jnp.bfloat16), w4_ref[...]) + b4_ref[...]

    o_ref[...] = jax.nn.sigmoid(z).astype(o_ref.dtype)


def mlp4_pallas(x, params, *, tm=None, out_dtype=jnp.float32, bf16_act=None):
    """Run the 4-layer MLP on rows of x with a single pallas_call.

    x: (N, d_in) — any float dtype; cast to bf16 (halves the x-tile DMA).
    params: dict with w1..w4 / b1..b4.  Weights are bf16 matmul operands
    (pre-cast once with prepare_mlp4_params so no per-call casts and no f32
    weight copies); biases are f32 (added to the f32 accumulator).
    """
    n, d_in = x.shape
    d_out = params["w4"].shape[1]
    if bf16_act is None:
        bf16_act = _USE_BF16_ACT
    if tm is None:
        tm = _pick_tm(n)
    else:
        tm = max(8, min(_round_up(tm, 8), _round_up(n, 8)))

    x = x.astype(jnp.bfloat16)
    # No-ops when params were prepared with prepare_mlp4_params.
    w1, w2, w3, w4 = (params[f"w{i}"].astype(jnp.bfloat16) for i in range(1, 5))
    b1, b2, b3, b4 = (params[f"b{i}"].astype(jnp.float32) for i in range(1, 5))

    # Ragged last block (n % tm != 0) is handled by Pallas' partial-block
    # masking: garbage rows flow through tanh/sigmoid and the out-of-bounds
    # output rows are discarded.  No pad / slice HBM round trip.
    grid = (pl.cdiv(n, tm),)

    # Constant index_map -> weights/biases fetched into VMEM once, not
    # re-DMA'd per grid step.
    # TODO(synk): pipeline_mode=pl.Buffered(1) on these constant specs would
    # also drop their (pointless) double buffers (~0.5 MiB VMEM hygiene).
    full = lambda a: pl.BlockSpec(a.shape, lambda i: (0,) * a.ndim)

    return pl.pallas_call(
        functools.partial(_mlp4_kernel, bf16_act=bf16_act),
        out_shape=jax.ShapeDtypeStruct((n, d_out), out_dtype),
        grid=grid,
        in_specs=[
            pl.BlockSpec((tm, d_in), lambda i: (i, 0)),   # row tile of x
            full(w1), full(b1),
            full(w2), full(b2),
            full(w3), full(b3),
            full(w4), full(b4),
        ],
        out_specs=pl.BlockSpec((tm, d_out), lambda i: (i, 0)),
        compiler_params=pltpu.CompilerParams(
            dimension_semantics=("parallel",)),
    )(x, w1, b1, w2, b2, w3, b3, w4, b4)


def _init_linear(key, fan_in, fan_out):
    """Deterministic PyTorch-style nn.Linear init (uniform +-1/sqrt(fan_in))."""
    kw, kb = jax.random.split(key)
    bound = 1.0 / jnp.sqrt(jnp.float32(fan_in))
    w = jax.random.uniform(kw, (fan_in, fan_out), jnp.float32, -bound, bound)
    b = jax.random.uniform(kb, (1, fan_out), jnp.float32, -bound, bound)
    return w, b


def init_mlp4(key, d_in, d_out):
    ks = jax.random.split(key, 4)
    w1, b1 = _init_linear(ks[0], d_in, HIDDEN)
    w2, b2 = _init_linear(ks[1], HIDDEN, HIDDEN)
    w3, b3 = _init_linear(ks[2], HIDDEN, HIDDEN)
    w4, b4 = _init_linear(ks[3], HIDDEN, d_out)
    return dict(w1=w1, b1=b1, w2=w2, b2=b2, w3=w3, b3=b3, w4=w4, b4=b4)


def prepare_mlp4_params(params):
    """One-time dtype prep (call OUTSIDE the jitted forward): bf16 matmul
    weights, f32 biases — no per-call casts, half the weight HBM footprint."""
    out = {}
    for i in range(1, 5):
        out[f"w{i}"] = params[f"w{i}"].astype(jnp.bfloat16)
        out[f"b{i}"] = params[f"b{i}"].astype(jnp.float32)
    return out


@functools.partial(jax.jit, static_argnames=("k", "input_size", "mid"))
def gnn_layer_forward(x, edge_index, edge_attr, params1, params2,
                      *, k, input_size, mid):
    """GNNLayer.forward(data) with data = (x, edge_index, edge_attr).

    Assumes the standard setup for this module: E = N*k edges, edges for node i
    contiguous (rows i*k .. i*k+k-1), edge_attr dim A with k*A == input_size.
    """
    # ---- GNN1: message = edge_attr; aggregate = MLP1(edge_attr.reshape(-1, input_size))
    inp1 = edge_attr.reshape(-1, input_size).astype(jnp.bfloat16)
    out1 = mlp4_pallas(inp1, params1, out_dtype=jnp.bfloat16)      # (N, mid) bf16

    # ---- GNN2: message = x_j = out1[edge_index[1]] (flow='target_to_source')
    # out1 is emitted in bf16, so this gather + inp2 HBM round trip is half the
    # bytes of the f32 version.
    # TODO(synk): fuse this neighbor gather into MLP2's pallas_call (scalar-
    # prefetched edge_index driving an in-kernel gather of a VMEM-resident out1
    # slab); an in-kernel sublane gather of 5-wide rows is not a lowering path
    # we can rely on, so it stays as XLA glue for now.
    x_j = jnp.take(out1, edge_index[1], axis=0)                    # (E, mid)
    inp2 = x_j.reshape(-1, k * mid)                                # (N, k*mid) bf16
    out2 = mlp4_pallas(inp2, params2, out_dtype=jnp.float32)       # (N, 1)

    # ---- squeeze(out2, 1)
    return out2[:, 0]


def _mlp_ref(xx, p):
    h = jnp.tanh(xx @ p["w1"] + p["b1"])
    h = jnp.tanh(h @ p["w2"] + p["b2"])
    h = jnp.tanh(h @ p["w3"] + p["b3"])
    return jax.nn.sigmoid(h @ p["w4"] + p["b4"])


def _reference_forward(x, edge_index, edge_attr, params1, params2,
                       *, k, input_size, mid):
    """Pure-JAX f32 reference mirroring the PyTorch module."""
    out1 = _mlp_ref(edge_attr.reshape(-1, input_size), params1)
    x_j = out1[edge_index[1]]
    out2 = _mlp_ref(x_j.reshape(-1, k * mid), params2)
    return out2[:, 0]


if __name__ == "__main__":
    # Small deterministic example consistent with the module.
    N = 8            # number of nodes
    k = 4            # neighbors per node
    A = 2            # per-edge attribute dim
    input_size = k * A        # GNN1 input_size = 8
    mid = 5                   # mid_layer_size
    E = N * k

    key = jax.random.PRNGKey(0)
    kx, ka, k1, k2, kr = jax.random.split(key, 5)

    x = jax.random.normal(kx, (N, 3), jnp.float32)          # node features (unused by compute)
    edge_attr = jax.random.normal(ka, (E, A), jnp.float32)  # per-edge attributes

    # edge_index: for node i, k edges; row 0 = source i, row 1 = neighbor (target).
    src = jnp.repeat(jnp.arange(N), k)
    dst = (jnp.repeat(jnp.arange(N), k) + jnp.tile(jnp.arange(1, k + 1), N)) % N
    edge_index = jnp.stack([src, dst]).astype(jnp.int32)     # (2, E)

    params1_f32 = init_mlp4(k1, input_size, mid)        # GNN1: input_size -> 5
    params2_f32 = init_mlp4(k2, k * mid, 1)             # GNN2: k*5 -> 1
    params1 = prepare_mlp4_params(params1_f32)          # bf16 weights, f32 biases
    params2 = prepare_mlp4_params(params2_f32)

    out = gnn_layer_forward(x, edge_index, edge_attr, params1, params2,
                            k=k, input_size=input_size, mid=mid)
    out = jax.block_until_ready(out)

    ref = _reference_forward(x, edge_index, edge_attr, params1_f32, params2_f32,
                             k=k, input_size=input_size, mid=mid)
    assert out.shape == (N,)
    # bf16 matmul operands (+ bf16 tanh on v6e/v7x) with f32 accumulation vs.
    # pure-f32 reference.
    assert jnp.allclose(out, ref, atol=2e-2, rtol=2e-2), (
        f"max abs err {jnp.max(jnp.abs(out - ref))}")

    # Extra correctness check: ragged last block (n % tm != 0), which the tiny
    # demo grid never exercises — force tm=16 over 40 rows (blocks 16/16/8).
    x_rag = jax.random.normal(kr, (40, input_size), jnp.float32)
    out_rag = jax.block_until_ready(mlp4_pallas(x_rag, params1, tm=16))
    ref_rag = _mlp_ref(x_rag, params1_f32)
    assert out_rag.shape == ref_rag.shape
    assert jnp.allclose(out_rag, ref_rag, atol=2e-2, rtol=2e-2), (
        f"ragged max abs err {jnp.max(jnp.abs(out_rag - ref_rag))}")

    print("KERNEL_OK")
</pallas_src>

<mosaic_0001>
module attributes {stable_mosaic.version = 11 : i64} {
  func.func @_mlp4_kernel(%arg0: i32, %arg1: memref<8x8xbf16, #tpu.memory_space<vmem>>, %arg2: memref<8x256xbf16, #tpu.memory_space<vmem>>, %arg3: memref<1x256xf32, #tpu.memory_space<vmem>>, %arg4: memref<256x256xbf16, #tpu.memory_space<vmem>>, %arg5: memref<1x256xf32, #tpu.memory_space<vmem>>, %arg6: memref<256x256xbf16, #tpu.memory_space<vmem>>, %arg7: memref<1x256xf32, #tpu.memory_space<vmem>>, %arg8: memref<256x5xbf16, #tpu.memory_space<vmem>>, %arg9: memref<1x5xf32, #tpu.memory_space<vmem>>, %arg10: memref<8x5xbf16, #tpu.memory_space<vmem>>) attributes {dimension_semantics = [#tpu.dimension_semantics<parallel>], iteration_bounds = array<i64: 1>, scalar_prefetch = 0 : i64, scratch_operands = 0 : i64, tpu.core_type = #tpu.core_type<tc>, window_params = [{transform_indices = @transform_0, window_bounds = array<i64: 8, 8>}, {pipeline_mode = #tpu.pipeline_mode<synchronous>, transform_indices = @transform_1, window_bounds = array<i64: 8, 256>}, {pipeline_mode = #tpu.pipeline_mode<synchronous>, transform_indices = @transform_2, window_bounds = array<i64: 1, 256>}, {pipeline_mode = #tpu.pipeline_mode<synchronous>, transform_indices = @transform_3, window_bounds = array<i64: 256, 256>}, {pipeline_mode = #tpu.pipeline_mode<synchronous>, transform_indices = @transform_4, window_bounds = array<i64: 1, 256>}, {pipeline_mode = #tpu.pipeline_mode<synchronous>, transform_indices = @transform_5, window_bounds = array<i64: 256, 256>}, {pipeline_mode = #tpu.pipeline_mode<synchronous>, transform_indices = @transform_6, window_bounds = array<i64: 1, 256>}, {pipeline_mode = #tpu.pipeline_mode<synchronous>, transform_indices = @transform_7, window_bounds = array<i64: 256, 5>}, {pipeline_mode = #tpu.pipeline_mode<synchronous>, transform_indices = @transform_8, window_bounds = array<i64: 1, 5>}, {transform_indices = @transform_9, window_bounds = array<i64: 8, 5>}]} {
    %c0 = arith.constant 0 : index
    %c0_0 = arith.constant 0 : index
    %0 = vector.load %arg1[%c0, %c0_0] : memref<8x8xbf16, #tpu.memory_space<vmem>>, vector<8x8xbf16>
    %c0_1 = arith.constant 0 : index
    %c0_2 = arith.constant 0 : index
    %1 = vector.load %arg2[%c0_1, %c0_2] : memref<8x256xbf16, #tpu.memory_space<vmem>>, vector<8x256xbf16>
    %cst = arith.constant dense<0.000000e+00> : vector<8x256xf32>
    %2 = tpu.matmul %0, %1, %cst {dimension_numbers = #tpu.dot_dimension_numbers<[1], [0], [0], [1], [0, 0, 1, 1], [], []>} : vector<8x8xbf16>, vector<8x256xbf16>, vector<8x256xf32> -> vector<8x256xf32>
    %c0_3 = arith.constant 0 : index
    %c0_4 = arith.constant 0 : index
    %3 = vector.load %arg3[%c0_3, %c0_4] : memref<1x256xf32, #tpu.memory_space<vmem>>, vector<1x256xf32>
    %4 = vector.broadcast %3 : vector<1x256xf32> to vector<8x256xf32>
    %5 = arith.addf %2, %4 : vector<8x256xf32>
    %6 = math.tanh %5 : vector<8x256xf32>
    %7 = arith.truncf %6 : vector<8x256xf32> to vector<8x256xbf16>
    %c0_5 = arith.constant 0 : index
    %c0_6 = arith.constant 0 : index
    %8 = vector.load %arg4[%c0_5, %c0_6] : memref<256x256xbf16, #tpu.memory_space<vmem>>, vector<256x256xbf16>
    %cst_7 = arith.constant dense<0.000000e+00> : vector<8x256xf32>
    %9 = tpu.matmul %7, %8, %cst_7 {dimension_numbers = #tpu.dot_dimension_numbers<[1], [0], [0], [1], [0, 0, 1, 1], [], []>} : vector<8x256xbf16>, vector<256x256xbf16>, vector<8x256xf32> -> vector<8x256xf32>
    %c0_8 = arith.constant 0 : index
    %c0_9 = arith.constant 0 : index
    %10 = vector.load %arg5[%c0_8, %c0_9] : memref<1x256xf32, #tpu.memory_space<vmem>>, vector<1x256xf32>
    %11 = vector.broadcast %10 : vector<1x256xf32> to vector<8x256xf32>
    %12 = arith.addf %9, %11 : vector<8x256xf32>
    %13 = math.tanh %12 : vector<8x256xf32>
    %14 = arith.truncf %13 : vector<8x256xf32> to vector<8x256xbf16>
    %c0_10 = arith.constant 0 : index
    %c0_11 = arith.constant 0 : index
    %15 = vector.load %arg6[%c0_10, %c0_11] : memref<256x256xbf16, #tpu.memory_space<vmem>>, vector<256x256xbf16>
    %cst_12 = arith.constant dense<0.000000e+00> : vector<8x256xf32>
    %16 = tpu.matmul %14, %15, %cst_12 {dimension_numbers = #tpu.dot_dimension_numbers<[1], [0], [0], [1], [0, 0, 1, 1], [], []>} : vector<8x256xbf16>, vector<256x256xbf16>, vector<8x256xf32> -> vector<8x256xf32>
    %c0_13 = arith.constant 0 : index
    %c0_14 = arith.constant 0 : index
    %17 = vector.load %arg7[%c0_13, %c0_14] : memref<1x256xf32, #tpu.memory_space<vmem>>, vector<1x256xf32>
    %18 = vector.broadcast %17 : vector<1x256xf32> to vector<8x256xf32>
    %19 = arith.addf %16, %18 : vector<8x256xf32>
    %20 = math.tanh %19 : vector<8x256xf32>
    %21 = arith.truncf %20 : vector<8x256xf32> to vector<8x256xbf16>
    %c0_15 = arith.constant 0 : index
    %c0_16 = arith.constant 0 : index
    %22 = vector.load %arg8[%c0_15, %c0_16] : memref<256x5xbf16, #tpu.memory_space<vmem>>, vector<256x5xbf16>
    %cst_17 = arith.constant dense<0.000000e+00> : vector<8x5xf32>
    %23 = tpu.matmul %21, %22, %cst_17 {dimension_numbers = #tpu.dot_dimension_numbers<[1], [0], [0], [1], [0, 0, 1, 1], [], []>} : vector<8x256xbf16>, vector<256x5xbf16>, vector<8x5xf32> -> vector<8x5xf32>
    %c0_18 = arith.constant 0 : index
    %c0_19 = arith.constant 0 : index
    %24 = vector.load %arg9[%c0_18, %c0_19] : memref<1x5xf32, #tpu.memory_space<vmem>>, vector<1x5xf32>
    %25 = vector.broadcast %24 : vector<1x5xf32> to vector<8x5xf32>
    %26 = arith.addf %23, %25 : vector<8x5xf32>
    %27 = arith.negf %26 : vector<8x5xf32>
    %28 = math.exp %27 : vector<8x5xf32>
    %cst_20 = arith.constant 1.000000e+00 : f32
    %29 = vector.broadcast %cst_20 : f32 to vector<8x5xf32>
    %30 = arith.addf %29, %28 : vector<8x5xf32>
    %31 = arith.divf %29, %30 : vector<8x5xf32>
    %32 = arith.truncf %31 : vector<8x5xf32> to vector<8x5xbf16>
    %c0_21 = arith.constant 0 : index
    %c0_22 = arith.constant 0 : index
    %33 = vector.load %arg10[%c0_21, %c0_22] : memref<8x5xbf16, #tpu.memory_space<vmem>>, vector<8x5xbf16>
    tpu.vector_store %arg10[%c0_21, %c0_22], %32 {strides = array<i32>} : memref<8x5xbf16, #tpu.memory_space<vmem>>, vector<8x5xbf16>,
    return
  }
  func.func @transform_0(%arg0: i32) -> (i32, i32) {
    %c0_i32 = arith.constant 0 : i32
    %c0_i32_0 = arith.constant 0 : i32
    return %arg0, %c0_i32 : i32, i32
  }
  func.func @transform_1(%arg0: i32) -> (i32, i32) {
    %c0_i32 = arith.constant 0 : i32
    %c0_i32_0 = arith.constant 0 : i32
    %c0_i32_1 = arith.constant 0 : i32
    return %c0_i32, %c0_i32_0 : i32, i32
  }
  func.func @transform_2(%arg0: i32) -> (i32, i32) {
    %c0_i32 = arith.constant 0 : i32
    %c0_i32_0 = arith.constant 0 : i32
    %c0_i32_1 = arith.constant 0 : i32
    return %c0_i32, %c0_i32_0 : i32, i32
  }
  func.func @transform_3(%arg0: i32) -> (i32, i32) {
    %c0_i32 = arith.constant 0 : i32
    %c0_i32_0 = arith.constant 0 : i32
    %c0_i32_1 = arith.constant 0 : i32
    return %c0_i32, %c0_i32_0 : i32, i32
  }
  func.func @transform_4(%arg0: i32) -> (i32, i32) {
    %c0_i32 = arith.constant 0 : i32
    %c0_i32_0 = arith.constant 0 : i32
    %c0_i32_1 = arith.constant 0 : i32
    return %c0_i32, %c0_i32_0 : i32, i32
  }
  func.func @transform_5(%arg0: i32) -> (i32, i32) {
    %c0_i32 = arith.constant 0 : i32
    %c0_i32_0 = arith.constant 0 : i32
    %c0_i32_1 = arith.constant 0 : i32
    return %c0_i32, %c0_i32_0 : i32, i32
  }
  func.func @transform_6(%arg0: i32) -> (i32, i32) {
    %c0_i32 = arith.constant 0 : i32
    %c0_i32_0 = arith.constant 0 : i32
    %c0_i32_1 = arith.constant 0 : i32
    return %c0_i32, %c0_i32_0 : i32, i32
  }
  func.func @transform_7(%arg0: i32) -> (i32, i32) {
    %c0_i32 = arith.constant 0 : i32
    %c0_i32_0 = arith.constant 0 : i32
    %c0_i32_1 = arith.constant 0 : i32
    return %c0_i32, %c0_i32_0 : i32, i32
  }
  func.func @transform_8(%arg0: i32) -> (i32, i32) {
    %c0_i32 = arith.constant 0 : i32
    %c0_i32_0 = arith.constant 0 : i32
    %c0_i32_1 = arith.constant 0 : i32
    return %c0_i32, %c0_i32_0 : i32, i32
  }
  func.func @transform_9(%arg0: i32) -> (i32, i32) {
    %c0_i32 = arith.constant 0 : i32
    %c0_i32_0 = arith.constant 0 : i32
    return %arg0, %c0_i32 : i32, i32
  }
}

module attributes {stable_mosaic.version = 11 : i64} {
  func.func @_mlp4_kernel(%arg0: i32, %arg1: memref<8x20xbf16, #tpu.memory_space<vmem>>, %arg2: memref<20x256xbf16, #tpu.memory_space<vmem>>, %arg3: memref<1x256xf32, #tpu.memory_space<vmem>>, %arg4: memref<256x256xbf16, #tpu.memory_space<vmem>>, %arg5: memref<1x256xf32, #tpu.memory_space<vmem>>, %arg6: memref<256x256xbf16, #tpu.memory_space<vmem>>, %arg7: memref<1x256xf32, #tpu.memory_space<vmem>>, %arg8: memref<256x1xbf16, #tpu.memory_space<vmem>>, %arg9: memref<1x1xf32, #tpu.memory_space<vmem>>, %arg10: memref<8x1xf32, #tpu.memory_space<vmem>>) attributes {dimension_semantics = [#tpu.dimension_semantics<parallel>], iteration_bounds = array<i64: 1>, scalar_prefetch = 0 : i64, scratch_operands = 0 : i64, tpu.core_type = #tpu.core_type<tc>, window_params = [{transform_indices = @transform_0, window_bounds = array<i64: 8, 20>}, {pipeline_mode = #tpu.pipeline_mode<synchronous>, transform_indices = @transform_1, window_bounds = array<i64: 20, 256>}, {pipeline_mode = #tpu.pipeline_mode<synchronous>, transform_indices = @transform_2, window_bounds = array<i64: 1, 256>}, {pipeline_mode = #tpu.pipeline_mode<synchronous>, transform_indices = @transform_3, window_bounds = array<i64: 256, 256>}, {pipeline_mode = #tpu.pipeline_mode<synchronous>, transform_indices = @transform_4, window_bounds = array<i64: 1, 256>}, {pipeline_mode = #tpu.pipeline_mode<synchronous>, transform_indices = @transform_5, window_bounds = array<i64: 256, 256>}, {pipeline_mode = #tpu.pipeline_mode<synchronous>, transform_indices = @transform_6, window_bounds = array<i64: 1, 256>}, {pipeline_mode = #tpu.pipeline_mode<synchronous>, transform_indices = @transform_7, window_bounds = array<i64: 256, 1>}, {pipeline_mode = #tpu.pipeline_mode<synchronous>, transform_indices = @transform_8, window_bounds = array<i64: 1, 1>}, {transform_indices = @transform_9, window_bounds = array<i64: 8, 1>}]} {
    %c0 = arith.constant 0 : index
    %c0_0 = arith.constant 0 : index
    %0 = vector.load %arg1[%c0, %c0_0] : memref<8x20xbf16, #tpu.memory_space<vmem>>, vector<8x20xbf16>
    %c0_1 = arith.constant 0 : index
    %c0_2 = arith.constant 0 : index
    %1 = vector.load %arg2[%c0_1, %c0_2] : memref<20x256xbf16, #tpu.memory_space<vmem>>, vector<20x256xbf16>
    %cst = arith.constant dense<0.000000e+00> : vector<8x256xf32>
    %2 = tpu.matmul %0, %1, %cst {dimension_numbers = #tpu.dot_dimension_numbers<[1], [0], [0], [1], [0, 0, 1, 1], [], []>} : vector<8x20xbf16>, vector<20x256xbf16>, vector<8x256xf32> -> vector<8x256xf32>
    %c0_3 = arith.constant 0 : index
    %c0_4 = arith.constant 0 : index
    %3 = vector.load %arg3[%c0_3, %c0_4] : memref<1x256xf32, #tpu.memory_space<vmem>>, vector<1x256xf32>
    %4 = vector.broadcast %3 : vector<1x256xf32> to vector<8x256xf32>
    %5 = arith.addf %2, %4 : vector<8x256xf32>
    %6 = math.tanh %5 : vector<8x256xf32>
    %7 = arith.truncf %6 : vector<8x256xf32> to vector<8x256xbf16>
    %c0_5 = arith.constant 0 : index
    %c0_6 = arith.constant 0 : index
    %8 = vector.load %arg4[%c0_5, %c0_6] : memref<256x256xbf16, #tpu.memory_space<vmem>>, vector<256x256xbf16>
    %cst_7 = arith.constant dense<0.000000e+00> : vector<8x256xf32>
    %9 = tpu.matmul %7, %8, %cst_7 {dimension_numbers = #tpu.dot_dimension_numbers<[1], [0], [0], [1], [0, 0, 1, 1], [], []>} : vector<8x256xbf16>, vector<256x256xbf16>, vector<8x256xf32> -> vector<8x256xf32>
    %c0_8 = arith.constant 0 : index
    %c0_9 = arith.constant 0 : index
    %10 = vector.load %arg5[%c0_8, %c0_9] : memref<1x256xf32, #tpu.memory_space<vmem>>, vector<1x256xf32>
    %11 = vector.broadcast %10 : vector<1x256xf32> to vector<8x256xf32>
    %12 = arith.addf %9, %11 : vector<8x256xf32>
    %13 = math.tanh %12 : vector<8x256xf32>
    %14 = arith.truncf %13 : vector<8x256xf32> to vector<8x256xbf16>
    %c0_10 = arith.constant 0 : index
    %c0_11 = arith.constant 0 : index
    %15 = vector.load %arg6[%c0_10, %c0_11] : memref<256x256xbf16, #tpu.memory_space<vmem>>, vector<256x256xbf16>
    %cst_12 = arith.constant dense<0.000000e+00> : vector<8x256xf32>
    %16 = tpu.matmul %14, %15, %cst_12 {dimension_numbers = #tpu.dot_dimension_numbers<[1], [0], [0], [1], [0, 0, 1, 1], [], []>} : vector<8x256xbf16>, vector<256x256xbf16>, vector<8x256xf32> -> vector<8x256xf32>
    %c0_13 = arith.constant 0 : index
    %c0_14 = arith.constant 0 : index
    %17 = vector.load %arg7[%c0_13, %c0_14] : memref<1x256xf32, #tpu.memory_space<vmem>>, vector<1x256xf32>
    %18 = vector.broadcast %17 : vector<1x256xf32> to vector<8x256xf32>
    %19 = arith.addf %16, %18 : vector<8x256xf32>
    %20 = math.tanh %19 : vector<8x256xf32>
    %21 = arith.truncf %20 : vector<8x256xf32> to vector<8x256xbf16>
    %c0_15 = arith.constant 0 : index
    %c0_16 = arith.constant 0 : index
    %22 = vector.load %arg8[%c0_15, %c0_16] : memref<256x1xbf16, #tpu.memory_space<vmem>>, vector<256x1xbf16>
    %cst_17 = arith.constant dense<0.000000e+00> : vector<8x1xf32>
    %23 = tpu.matmul %21, %22, %cst_17 {dimension_numbers = #tpu.dot_dimension_numbers<[1], [0], [0], [1], [0, 0, 1, 1], [], []>} : vector<8x256xbf16>, vector<256x1xbf16>, vector<8x1xf32> -> vector<8x1xf32>
    %c0_18 = arith.constant 0 : index
    %c0_19 = arith.constant 0 : index
    %24 = vector.load %arg9[%c0_18, %c0_19] : memref<1x1xf32, #tpu.memory_space<vmem>>, vector<1x1xf32>
    %25 = vector.broadcast %24 : vector<1x1xf32> to vector<8x1xf32>
    %26 = arith.addf %23, %25 : vector<8x1xf32>
    %27 = arith.negf %26 : vector<8x1xf32>
    %28 = math.exp %27 : vector<8x1xf32>
    %cst_20 = arith.constant 1.000000e+00 : f32
    %29 = vector.broadcast %cst_20 : f32 to vector<8x1xf32>
    %30 = arith.addf %29, %28 : vector<8x1xf32>
    %31 = arith.divf %29, %30 : vector<8x1xf32>
    %c0_21 = arith.constant 0 : index
    %c0_22 = arith.constant 0 : index
    %32 = vector.load %arg10[%c0_21, %c0_22] : memref<8x1xf32, #tpu.memory_space<vmem>>, vector<8x1xf32>
    tpu.vector_store %arg10[%c0_21, %c0_22], %31 {strides = array<i32>} : memref<8x1xf32, #tpu.memory_space<vmem>>, vector<8x1xf32>,
    return
  }
  func.func @transform_0(%arg0: i32) -> (i32, i32) {
    %c0_i32 = arith.constant 0 : i32
    %c0_i32_0 = arith.constant 0 : i32
    return %arg0, %c0_i32 : i32, i32
  }
  func.func @transform_1(%arg0: i32) -> (i32, i32) {
    %c0_i32 = arith.constant 0 : i32
    %c0_i32_0 = arith.constant 0 : i32
    %c0_i32_1 = arith.constant 0 : i32
    return %c0_i32, %c0_i32_0 : i32, i32
  }
  func.func @transform_2(%arg0: i32) -> (i32, i32) {
    %c0_i32 = arith.constant 0 : i32
    %c0_i32_0 = arith.constant 0 : i32
    %c0_i32_1 = arith.constant 0 : i32
    return %c0_i32, %c0_i32_0 : i32, i32
  }
  func.func @transform_3(%arg0: i32) -> (i32, i32) {
    %c0_i32 = arith.constant 0 : i32
    %c0_i32_0 = arith.constant 0 : i32
    %c0_i32_1 = arith.constant 0 : i32
    return %c0_i32, %c0_i32_0 : i32, i32
  }
  func.func @transform_4(%arg0: i32) -> (i32, i32) {
    %c0_i32 = arith.constant 0 : i32
    %c0_i32_0 = arith.constant 0 : i32
    %c0_i32_1 = arith.constant 0 : i32
    return %c0_i32, %c0_i32_0 : i32, i32
  }
  func.func @transform_5(%arg0: i32) -> (i32, i32) {
    %c0_i32 = arith.constant 0 : i32
    %c0_i32_0 = arith.constant 0 : i32
    %c0_i32_1 = arith.constant 0 : i32
    return %c0_i32, %c0_i32_0 : i32, i32
  }
  func.func @transform_6(%arg0: i32) -> (i32, i32) {
    %c0_i32 = arith.constant 0 : i32
    %c0_i32_0 = arith.constant 0 : i32
    %c0_i32_1 = arith.constant 0 : i32
    return %c0_i32, %c0_i32_0 : i32, i32
  }
  func.func @transform_7(%arg0: i32) -> (i32, i32) {
    %c0_i32 = arith.constant 0 : i32
    %c0_i32_0 = arith.constant 0 : i32
    %c0_i32_1 = arith.constant 0 : i32
    return %c0_i32, %c0_i32_0 : i32, i32
  }
  func.func @transform_8(%arg0: i32) -> (i32, i32) {
    %c0_i32 = arith.constant 0 : i32
    %c0_i32_0 = arith.constant 0 : i32
    %c0_i32_1 = arith.constant 0 : i32
    return %c0_i32, %c0_i32_0 : i32, i32
  }
  func.func @transform_9(%arg0: i32) -> (i32, i32) {
    %c0_i32 = arith.constant 0 : i32
    %c0_i32_0 = arith.constant 0 : i32
    return %arg0, %c0_i32 : i32, i32
  }
}

</mosaic_0001>

<bundles_post_ra>
// kernel: gnn_layer_forward.2
= control target key start
LH: loop header
LB: loop body
LE: loop exit
PB: predicated region body
PF: predicated region fallthrough
CT: control target
= control target key end

     0   :  { %14 = vsyncpa [#allocation3], 0  ;;  %s1422_s0 = inlined_call_operand.vmem [shape: bf16[8,8], index: 0, kind: input, shape index: {}]   ;;  %s1423_s1 = inlined_call_operand.vmem [shape: bf16[8,256], index: 1, kind: input, shape index: {}]   ;;  %s1424_s2 = inlined_call_operand.vmem [shape: f32[1,256], index: 2, kind: input, shape index: {}]   ;;  %s1425_s3 = inlined_call_operand.hbm [shape: bf16[256,256], index: 3, kind: input, shape index: {}]   ;;  %s1426_s4 = inlined_call_operand.vmem [shape: f32[1,256], index: 4, kind: input, shape index: {}]   ;;  %s1427_s5 = inlined_call_operand.hbm [shape: bf16[256,256], index: 5, kind: input, shape index: {}]   ;;  %s1428_s6 = inlined_call_operand.vmem [shape: f32[1,256], index: 6, kind: input, shape index: {}]   ;;  %s1429_s7 = inlined_call_operand.vmem [shape: bf16[256,5], index: 7, kind: input, shape index: {}]   ;;  %s1430_s8 = inlined_call_operand.vmem [shape: f32[1,5], index: 8, kind: input, shape index: {}]   ;;  %s1431_s9 = inlined_call_operand.vmem [shape: bf16[8,5], index: 9, kind: output, shape index: {}]  }
   0x1   :  { %s26_s11 = sshll.u32 %s1425_s3, 4  ;;  %s27_s11 = int_to_ptr.hbm [resolvable:$true] %s26_s11 }
   0x2   :  { %15 = vsyncpa [#allocation5], 0  ;;  %s1289_s12 = smov [#allocation2]   ;;  %s41_s16 = sshll.u32 %s1427_s5, 4  ;;  %s42_s16 = int_to_ptr.hbm [resolvable:$true] %s41_s16 }
   0x3   :  { %s28_s13 = sshll.u32 %s1289_s12, 4  ;;  %s1290_s17 = smov 128   ;;  %s29_s13 = int_to_ptr.vmem [resolvable:$true] %s28_s13 }
   0x4   :  { %s1291_s18 = smov 8   ;;  %s1292_s19 = smov [#allocation4]  }
   0x5   :  { %34 = dma.hbm_to_vmem [thread:$0]  %s27_s11, 4096, %s29_s13, [#allocation3], %s1290_s17, %s1290_s17, %s1291_s18  }
   0x6   :  { %s43_s20 = sshll.u32 %s1292_s19, 4  ;;  %s44_s20 = int_to_ptr.vmem [resolvable:$true] %s43_s20 }
   0x7   :  { %49 = dma.hbm_to_vmem [thread:$0]  %s42_s16, 4096, %s44_s20, [#allocation5], %s1290_s17, %s1290_s17, %s1291_s18  }
   0x8   :  { %1285 = dma.done.wait [#allocation3], 4096  }
   0x9   :  { %1286 = vsyncadd [#allocation3], 4294963200 }
   0xa   :  { %1287 = dma.done.wait [#allocation5], 4096  }
   0xb   :  { %1288 = vsyncadd [#allocation5], 4294963200  ;;  %v66_v0 = vld [vmem:[%s1423_s1] sm:$0xff]  ;;  %vm82_vm0 = vcmask 1043456   ;;  %vm78_vm1 = vcmask 64512   ;;  %vm805_vm6 = vcmask 35840  }
   0xc   :  { %v873_v1 = vld [vmem:[#allocation2 + $0x70] sm:$0xf]  ;;  %v74_v2 = vunpack.c.l.b16 %v66_v0  ;;  %v75_v3 = vunpack.c.h.b16 %v66_v0  ;;  %v1151_v4 = vld [vmem:[#allocation2 + $0x74] sm:$0xf0]  ;;  %v1150_v9 = vld [vmem:[#allocation2 + $0x74] sm:$0xf] }
   0xd   :  { %v937_v5 = vld [vmem:[#allocation2 + $0xf0] sm:$0xf]  ;;  %v1167_v6 = vld [vmem:[#allocation2 + $0xf4] sm:$0xf0]  ;;  %v874_v7 = vor.u32 %v1151_v4, %v873_v1  ;;  %v875_v10 = vld [vmem:[#allocation2 + $0x78] sm:$0xf0] }
   0xe   :  { %v938_v8 = vor.u32 %v1167_v6, %v937_v5  ;;  %v1166_v11 = vld [vmem:[#allocation2 + $0xf4] sm:$0xf]  ;;  %v76_v12 = vpack.c.b16 %v74_v2, %v74_v2  ;;  %v77_v13 = vpack.c.b16 %v75_v3, %v75_v3  ;;  %v878_v14 = vor.u32 %v1150_v9, %v875_v10  ;;  %v939_v15 = vld [vmem:[#allocation2 + $0xf8] sm:$0xf0]  ;;  %v865_v16 = vld [vmem:[#allocation2 + $0x60] sm:$0xf] }
   0xf   :  { %v1149_v17 = vld [vmem:[#allocation2 + $0x64] sm:$0xf0]  ;;  %v65_v18 = vld [vmem:[%s1422_s0] sm:$0xf]  ;;  %317 = vmatpush.bf16.msra.mxu2 %v874_v7  ;;  %v942_v19 = vor.u32 %v1166_v11, %v939_v15  ;;  %v1148_v23 = vld [vmem:[#allocation2 + $0x64] sm:$0xf] }
  0x10   :  { %330 = vmatpush.bf16.msra.mxu3 %v938_v8  ;;  %v866_v20 = vor.u32 %v1149_v17, %v865_v16  ;;  %v929_v21 = vld [vmem:[#allocation2 + $0xe0] sm:$0xf]  ;;  %v1165_v22 = vld [vmem:[#allocation2 + $0xe4] sm:$0xf0]  ;;  %v84_v24 = vsel %vm82_vm0, %v76_v12, 0  ;;  %v87_v25 = vsel %vm82_vm0, %v77_v13, 0 }
  0x11   :  { %v930_v26 = vor.u32 %v1165_v22, %v929_v21  ;;  %v867_v27 = vld [vmem:[#allocation2 + $0x68] sm:$0xf0]  ;;  %v1164_v28 = vld [vmem:[#allocation2 + $0xe4] sm:$0xf]  ;;  %96 = vmatpush.bf16.msra.mxu0 %v84_v24  ;;  %109 = vmatpush.bf16.msra.mxu1 %v87_v25  ;;  %v857_v30 = vld [vmem:[#allocation2 + $0x50] sm:$0xf] }
  0x12   :  { %v931_v29 = vld [vmem:[#allocation2 + $0xe8] sm:$0xf0]  ;;  %v1147_v31 = vld [vmem:[#allocation2 + $0x54] sm:$0xf0]  ;;  %v870_v32 = vor.u32 %v1148_v23, %v867_v27  ;;  %v921_v34 = vld [vmem:[#allocation2 + $0xd0] sm:$0xf] }
  0x13   :  { %v934_v33 = vor.u32 %v1164_v28, %v931_v29  ;;  %v1163_v35 = vld [vmem:[#allocation2 + $0xd4] sm:$0xf0]  ;;  %v1146_v36 = vld [vmem:[#allocation2 + $0x54] sm:$0xf]  ;;  %318 = vmatpush.bf16.msra.mxu2 %v866_v20  ;;  %v858_v37 = vor.u32 %v1147_v31, %v857_v30  ;;  %v859_v39 = vld [vmem:[#allocation2 + $0x58] sm:$0xf0] }
  0x14   :  { %331 = vmatpush.bf16.msra.mxu3 %v930_v26  ;;  %v922_v38 = vor.u32 %v1163_v35, %v921_v34  ;;  %v1162_v40 = vld [vmem:[#allocation2 + $0xd4] sm:$0xf]  ;;  %v923_v41 = vld [vmem:[#allocation2 + $0xd8] sm:$0xf0]  ;;  %813 = vmatmul.msk.bf16.vlgmr.msra.gmra.mxu0 %vm78_vm1, %v65_v18  ;;  %v849_v42 = vld [vmem:[#allocation2 + $0x40] sm:$0xf]  ;;  %v862_v46 = vor.u32 %v1146_v36, %v859_v39 }
  0x15   :  { %343 = vmatpush.bf16.msrb.mxu0 %v878_v14  ;;  %356 = vmatpush.bf16.msrb.mxu1 %v942_v19  ;;  %v1145_v43 = vld [vmem:[#allocation2 + $0x44] sm:$0xf0]  ;;  %v913_v44 = vld [vmem:[#allocation2 + $0xc0] sm:$0xf]  ;;  %v926_v47 = vor.u32 %v1162_v40, %v923_v41  ;;  %v1144_v48 = vld [vmem:[#allocation2 + $0x44] sm:$0xf] }
  0x16   :  { %814 = vmatmul.msk.bf16.vlgmr.msra.gmra.mxu1 %vm78_vm1, %v65_v18  ;;  %v1161_v45 = vld [vmem:[#allocation2 + $0xc4] sm:$0xf0]  ;;  %v851_v49 = vld [vmem:[#allocation2 + $0x48] sm:$0xf0]  ;;  %v850_v50 = vor.u32 %v1145_v43, %v849_v42  ;;  %v1160_v52 = vld [vmem:[#allocation2 + $0xc4] sm:$0xf] }
  0x17   :  { %319 = vmatpush.bf16.msra.mxu2 %v858_v37  ;;  %v914_v51 = vor.u32 %v1161_v45, %v913_v44  ;;  %v915_v53 = vld [vmem:[#allocation2 + $0xc8] sm:$0xf0]  ;;  %v841_v54 = vld [vmem:[#allocation2 + $0x30] sm:$0xf]  ;;  %v1143_v55 = vld [vmem:[#allocation2 + $0x34] sm:$0xf0]  ;;  %v854_v58 = vor.u32 %v1144_v48, %v851_v49 }
  0x18   :  { %332 = vmatpush.bf16.msra.mxu3 %v922_v38  ;;  %v905_v56 = vld [vmem:[#allocation2 + $0xb0] sm:$0xf]  ;;  %v1159_v57 = vld [vmem:[#allocation2 + $0xb4] sm:$0xf0]  ;;  %v918_v59 = vor.u32 %v1160_v52, %v915_v53  ;;  %v1142_v60 = vld [vmem:[#allocation2 + $0x34] sm:$0xf]  ;;  %v842_v61 = vor.u32 %v1143_v55, %v841_v54 }
  0x19   :  { %344 = vmatpush.bf16.msrb.mxu0 %v870_v32  ;;  %357 = vmatpush.bf16.msrb.mxu1 %v934_v33  ;;  %v906_v62 = vor.u32 %v1159_v57, %v905_v56  ;;  %v843_v63 = vld [vmem:[#allocation2 + $0x38] sm:$0xf0]  ;;  %v1158_v0 = vld [vmem:[#allocation2 + $0xb4] sm:$0xf]  ;;  %v833_v4 = vld [vmem:[#allocation2 + $0x20] sm:$0xf] }
  0x1a   :  { %v907_v1 = vld [vmem:[#allocation2 + $0xb8] sm:$0xf0]  ;;  %v846_v2 = vor.u32 %v1142_v60, %v843_v63  ;;  %v1141_v5 = vld [vmem:[#allocation2 + $0x24] sm:$0xf0]  ;;  %v897_v7 = vld [vmem:[#allocation2 + $0xa0] sm:$0xf] }
  0x1b   :  { %320 = vmatpush.bf16.msra.mxu2 %v850_v50  ;;  %v910_v3 = vor.u32 %v1158_v0, %v907_v1  ;;  %v834_v6 = vor.u32 %v1141_v5, %v833_v4  ;;  %v1157_v8 = vld [vmem:[#allocation2 + $0xa4] sm:$0xf0]  ;;  %v1140_v9 = vld [vmem:[#allocation2 + $0x24] sm:$0xf]  ;;  %v835_v11 = vld [vmem:[#allocation2 + $0x28] sm:$0xf0] }
  0x1c   :  { %333 = vmatpush.bf16.msra.mxu3 %v914_v51  ;;  %v898_v10 = vor.u32 %v1157_v8, %v897_v7  ;;  %v1156_v12 = vld [vmem:[#allocation2 + $0xa4] sm:$0xf]  ;;  %v899_v13 = vld [vmem:[#allocation2 + $0xa8] sm:$0xf0]  ;;  %v838_v14 = vor.u32 %v1140_v9, %v835_v11  ;;  %v825_v16 = vld [vmem:[#allocation2 + $0x10] sm:$0xf] }
  0x1d   :  { %345 = vmatpush.bf16.msrb.mxu0 %v862_v46  ;;  %358 = vmatpush.bf16.msrb.mxu1 %v926_v47  ;;  %v902_v15 = vor.u32 %v1156_v12, %v899_v13  ;;  %v1139_v17 = vld [vmem:[#allocation2 + $0x14] sm:$0xf0]  ;;  %v889_v18 = vld [vmem:[#allocation2 + $0x90] sm:$0xf]  ;;  %v1138_v21 = vld [vmem:[#allocation2 + $0x14] sm:$0xf] }
  0x1e   :  { %v826_v19 = vor.u32 %v1139_v17, %v825_v16  ;;  %v1155_v20 = vld [vmem:[#allocation2 + $0x94] sm:$0xf0]  ;;  %v827_v22 = vld [vmem:[#allocation2 + $0x18] sm:$0xf0]  ;;  %v1154_v25 = vld [vmem:[#allocation2 + $0x94] sm:$0xf] }
  0x1f   :  { %321 = vmatpush.bf16.msra.mxu2 %v842_v61  ;;  %v890_v23 = vor.u32 %v1155_v20, %v889_v18  ;;  %v830_v24 = vor.u32 %v1138_v21, %v827_v22  ;;  %v891_v26 = vld [vmem:[#allocation2 + $0x98] sm:$0xf0]  ;;  %v817_v28 = vld [vmem:[#allocation2] sm:$0xf]  ;;  %v1137_v29 = vld [vmem:[#allocation2 + $0x4] sm:$0xf0] }
  0x20   :  { %334 = vmatpush.bf16.msra.mxu3 %v906_v62  ;;  %v894_v27 = vor.u32 %v1154_v25, %v891_v26  ;;  %v881_v30 = vld [vmem:[#allocation2 + $0x80] sm:$0xf]  ;;  %v818_v31 = vor.u32 %v1137_v29, %v817_v28  ;;  %v1153_v32 = vld [vmem:[#allocation2 + $0x84] sm:$0xf0]  ;;  %v1136_v33 = vld [vmem:[#allocation2 + $0x4] sm:$0xf] }
  0x21   :  { %346 = vmatpush.bf16.msrb.mxu0 %v854_v58  ;;  %359 = vmatpush.bf16.msrb.mxu1 %v918_v59  ;;  %v819_v34 = vld [vmem:[#allocation2 + $0x8] sm:$0xf0]  ;;  %v882_v35 = vor.u32 %v1153_v32, %v881_v30  ;;  %v1152_v37 = vld [vmem:[#allocation2 + $0x84] sm:$0xf]  ;;  %v1065_v40 = vld [vmem:[#allocation4 + $0xf0] sm:$0xf] }
  0x22   :  { %v822_v36 = vor.u32 %v1136_v33, %v819_v34  ;;  %v883_v38 = vld [vmem:[#allocation2 + $0x88] sm:$0xf0]  ;;  %v1199_v41 = vld [vmem:[#allocation4 + $0xf4] sm:$0xf0]  ;;  %v1198_v42 = vld [vmem:[#allocation4 + $0xf4] sm:$0xf] }
  0x23   :  { %322 = vmatpush.bf16.msra.mxu2 %v834_v6  ;;  %v886_v39 = vor.u32 %v1152_v37, %v883_v38  ;;  %v1066_v43 = vor.u32 %v1199_v41, %v1065_v40  ;;  %v1067_v44 = vld [vmem:[#allocation4 + $0xf8] sm:$0xf0]  ;;  %v1057_v45 = vld [vmem:[#allocation4 + $0xe0] sm:$0xf]  ;;  %v1197_v46 = vld [vmem:[#allocation4 + $0xe4] sm:$0xf0] }
  0x24   :  { %335 = vmatpush.bf16.msra.mxu3 %v898_v10  ;;  %v1070_v47 = vor.u32 %v1198_v42, %v1067_v44  ;;  %v1196_v48 = vld [vmem:[#allocation4 + $0xe4] sm:$0xf]  ;;  %v1059_v49 = vld [vmem:[#allocation4 + $0xe8] sm:$0xf0]  ;;  %v1001_v50 = vld [vmem:[#allocation4 + $0x70] sm:$0xf]  ;;  %v1058_v51 = vor.u32 %v1197_v46, %v1057_v45 }
  0x25   :  { %347 = vmatpush.bf16.msrb.mxu0 %v846_v2  ;;  %360 = vmatpush.bf16.msrb.mxu1 %v910_v3  ;;  %v1183_v52 = vld [vmem:[#allocation4 + $0x74] sm:$0xf0]  ;;  %v1182_v53 = vld [vmem:[#allocation4 + $0x74] sm:$0xf]  ;;  %v1003_v54 = vld [vmem:[#allocation4 + $0x78] sm:$0xf0]  ;;  %v1062_v55 = vor.u32 %v1196_v48, %v1059_v49 }
  0x26   :  { %v1002_v56 = vor.u32 %v1183_v52, %v1001_v50  ;;  %v1006_v57 = vor.u32 %v1182_v53, %v1003_v54  ;;  %v1049_v58 = vld [vmem:[#allocation4 + $0xd0] sm:$0xf]  ;;  %v1195_v59 = vld [vmem:[#allocation4 + $0xd4] sm:$0xf0]  ;;  %v1194_v60 = vld [vmem:[#allocation4 + $0xd4] sm:$0xf] }
  0x27   :  { %323 = vmatpush.bf16.msra.mxu2 %v826_v19  ;;  %v1051_v61 = vld [vmem:[#allocation4 + $0xd8] sm:$0xf0]  ;;  %v993_v62 = vld [vmem:[#allocation4 + $0x60] sm:$0xf]  ;;  %v1181_v63 = vld [vmem:[#allocation4 + $0x64] sm:$0xf0]  ;;  %v1050_v3 = vor.u32 %v1195_v59, %v1049_v58 }
  0x28   :  { %336 = vmatpush.bf16.msra.mxu3 %v890_v23  ;;  %v994_v0 = vor.u32 %v1181_v63, %v993_v62  ;;  %v1180_v1 = vld [vmem:[#allocation4 + $0x64] sm:$0xf]  ;;  %v995_v2 = vld [vmem:[#allocation4 + $0x68] sm:$0xf0]  ;;  %v1041_v5 = vld [vmem:[#allocation4 + $0xc0] sm:$0xf]  ;;  %v1054_v7 = vor.u32 %v1194_v60, %v1051_v61 }
  0x29   :  { %348 = vmatpush.bf16.msrb.mxu0 %v838_v14  ;;  %361 = vmatpush.bf16.msrb.mxu1 %v902_v15  ;;  %v998_v4 = vor.u32 %v1180_v1, %v995_v2  ;;  %v1193_v6 = vld [vmem:[#allocation4 + $0xc4] sm:$0xf0]  ;;  %v985_v8 = vld [vmem:[#allocation4 + $0x50] sm:$0xf]  ;;  %v1179_v9 = vld [vmem:[#allocation4 + $0x54] sm:$0xf0] }
  0x2a   :  { %v1178_v10 = vld [vmem:[#allocation4 + $0x54] sm:$0xf]  ;;  %v1192_v11 = vld [vmem:[#allocation4 + $0xc4] sm:$0xf]  ;;  %v1043_v12 = vld [vmem:[#allocation4 + $0xc8] sm:$0xf0]  ;;  %v986_v14 = vor.u32 %v1179_v9, %v985_v8  ;;  %v1042_v16 = vor.u32 %v1193_v6, %v1041_v5 }
  0x2b   :  { %324 = vmatpush.bf16.msra.mxu2 %v818_v31  ;;  %v987_v13 = vld [vmem:[#allocation4 + $0x58] sm:$0xf0]  ;;  %v1046_v17 = vor.u32 %v1192_v11, %v1043_v12  ;;  %v1033_v18 = vld [vmem:[#allocation4 + $0xb0] sm:$0xf]  ;;  %v1191_v19 = vld [vmem:[#allocation4 + $0xb4] sm:$0xf0] }
  0x2c   :  { %337 = vmatpush.bf16.msra.mxu3 %v882_v35  ;;  %v990_v15 = vor.u32 %v1178_v10, %v987_v13  ;;  %v67_v20 = vld [vmem:[%s1424_s2] sm:$0x3]  ;;  %v1190_v21 = vld [vmem:[#allocation4 + $0xb4] sm:$0xf]  ;;  %v1035_v22 = vld [vmem:[#allocation4 + $0xb8] sm:$0xf0]  ;;  %v1034_v23 = vor.u32 %v1191_v19, %v1033_v18 }
  0x2d   :  { %349 = vmatpush.bf16.msrb.mxu0 %v830_v24  ;;  %362 = vmatpush.bf16.msrb.mxu1 %v894_v27  ;;  %v69_v24 = vperm.slane %v67_v20, 0  ;;  %v70_v25 = vperm.slane %v67_v20, 1  ;;  %v1038_v26 = vor.u32 %v1190_v21, %v1035_v22  ;;  %v977_v37 = vld [vmem:[#allocation4 + $0x40] sm:$0xf]  ;;  %v1177_v38 = vld [vmem:[#allocation4 + $0x44] sm:$0xf0] }
  0x2e   :  { %v978_v40 = vor.u32 %v1177_v38, %v977_v37  ;;  %v979_v41 = vld [vmem:[#allocation4 + $0x48] sm:$0xf0]  ;;  %v1189_v44 = vld [vmem:[#allocation4 + $0xa4] sm:$0xf0]  ;;  %v1188_v45 = vld [vmem:[#allocation4 + $0xa4] sm:$0xf] }
  0x2f   :  { %571 = vmatpush.bf16.msrb.mxu2 %v1002_v56  ;;  %v969_v49 = vld [vmem:[#allocation4 + $0x30] sm:$0xf]  ;;  %v1175_v50 = vld [vmem:[#allocation4 + $0x34] sm:$0xf0]  ;;  %v971_v53 = vld [vmem:[#allocation4 + $0x38] sm:$0xf0] }
  0x30   :  { %584 = vmatpush.bf16.msrb.mxu3 %v1066_v43  ;;  %v1025_v43 = vld [vmem:[#allocation4 + $0xa0] sm:$0xf]  ;;  %v970_v52 = vor.u32 %v1175_v50, %v969_v49  ;;  %v1187_v56 = vld [vmem:[#allocation4 + $0x94] sm:$0xf0]  ;;  %v1019_v59 = vld [vmem:[#allocation4 + $0x98] sm:$0xf0] }
  0x31   :  { %350 = vmatpush.bf16.msrb.mxu0 %v822_v36  ;;  %363 = vmatpush.bf16.msrb.mxu1 %v886_v39  ;;  %v1176_v39 = vld [vmem:[#allocation4 + $0x44] sm:$0xf]  ;;  %v1026_v46 = vor.u32 %v1189_v44, %v1025_v43  ;;  %v961_v61 = vld [vmem:[#allocation4 + $0x20] sm:$0xf]  ;;  %v1173_v62 = vld [vmem:[#allocation4 + $0x24] sm:$0xf0] }
  0x32   :  { %v982_v42 = vor.u32 %v1176_v39, %v979_v41  ;;  %v1172_v63 = vld [vmem:[#allocation4 + $0x24] sm:$0xf]  ;;  %v963_v1 = vld [vmem:[#allocation4 + $0x28] sm:$0xf0]  ;;  %v953_v9 = vld [vmem:[#allocation4 + $0x10] sm:$0xf] }
  0x33   :  { %572 = vmatpush.bf16.msrb.mxu2 %v994_v0  ;;  %v962_v0 = vor.u32 %v1173_v62, %v961_v61  ;;  %v966_v2 = vor.u32 %v1172_v63, %v963_v1  ;;  %v1184_v5 = vld [vmem:[#allocation4 + $0x84] sm:$0xf]  ;;  %v1171_v10 = vld [vmem:[#allocation4 + $0x14] sm:$0xf0]  ;;  %v1170_v11 = vld [vmem:[#allocation4 + $0x14] sm:$0xf] }
  0x34   :  { %585 = vmatpush.bf16.msrb.mxu3 %v1058_v51  ;;  %v1174_v51 = vld [vmem:[#allocation4 + $0x34] sm:$0xf]  ;;  %v954_v12 = vor.u32 %v1171_v10, %v953_v9  ;;  %v955_v13 = vld [vmem:[#allocation4 + $0x18] sm:$0xf0]  ;;  %v947_v19 = vld [vmem:[#allocation4 + $0x8] sm:$0xf0] }
  0x35   :  { %610 = vmatpush.bf16.msra.mxu1 %v1070_v47  ;;  %597 = vmatpush.bf16.msra.mxu0 %v1006_v57  ;;  %v1027_v47 = vld [vmem:[#allocation4 + $0xa8] sm:$0xf0]  ;;  %v974_v54 = vor.u32 %v1174_v51, %v971_v53  ;;  %v1186_v57 = vld [vmem:[#allocation4 + $0x94] sm:$0xf]  ;;  %v1215_v21 = vld [vmem:[%s1429_s7 + $0x78] sm:$0xff] }
  0x36   :  { %v1030_v48 = vor.u32 %v1188_v45, %v1027_v47  ;;  %v1022_v60 = vor.u32 %v1186_v57, %v1019_v59  ;;  %v1207_v22 = vld [vmem:[%s1429_s7 + $0x38] sm:$0xff]  ;;  %v1212_v45 = vld [vmem:[%s1429_s7 + $0x60] sm:$0xff]  ;;  %v1210_v49 = vld [vmem:[%s1429_s7 + $0x50] sm:$0xff] }
  0x37   :  { %573 = vmatpush.bf16.msrb.mxu2 %v986_v14  ;;  %v958_v14 = vor.u32 %v1170_v11, %v955_v13  ;;  %v1211_v47 = vld [vmem:[%s1429_s7 + $0x58] sm:$0xff]  ;;  %v1209_v51 = vld [vmem:[%s1429_s7 + $0x48] sm:$0xff]  ;;  %v1208_v53 = vld [vmem:[%s1429_s7 + $0x40] sm:$0xff] }
  0x38   :  { %586 = vmatpush.bf16.msrb.mxu3 %v1050_v3  ;;  %v1009_v3 = vld [vmem:[#allocation4 + $0x80] sm:$0xf]  ;;  %v1203_v50 = vld [vmem:[%s1429_s7 + $0x18] sm:$0xff] }
  0x39   :  { %611 = vmatpush.bf16.msra.mxu1 %v1062_v55  ;;  %598 = vmatpush.bf16.msra.mxu0 %v998_v4  ;;  %v1017_v55 = vld [vmem:[#allocation4 + $0x90] sm:$0xf]  ;;  %v1185_v4 = vld [vmem:[#allocation4 + $0x84] sm:$0xf0]  ;;  %v405_v57 = vld [vmem:[%s1428_s6] sm:$0x3] }
  0x3a   :  { %v1018_v58 = vor.u32 %v1187_v56, %v1017_v55  ;;  %v1010_v6 = vor.u32 %v1185_v4, %v1009_v3  ;;  %v1200_v55 = vld [vmem:[%s1429_s7] sm:$0xff] }
  0x3b   :  { %574 = vmatpush.bf16.msrb.mxu2 %v978_v40 }
  0x3c   :  { %587 = vmatpush.bf16.msrb.mxu3 %v1042_v16  ;;  %v1169_v16 = vld [vmem:[#allocation4 + $0x4] sm:$0xf0] }
  0x3d   :  { %612 = vmatpush.bf16.msra.mxu1 %v1054_v7  ;;  %599 = vmatpush.bf16.msra.mxu0 %v990_v15  ;;  %v1011_v7 = vld [vmem:[#allocation4 + $0x88] sm:$0xf0]  ;;  %v945_v15 = vld [vmem:[#allocation4] sm:$0xf] }
  0x3e   :  { %v1014_v8 = vor.u32 %v1184_v5, %v1011_v7  ;;  %v946_v18 = vor.u32 %v1169_v16, %v945_v15 }
  0x3f   :  { %575 = vmatpush.bf16.msrb.mxu2 %v970_v52  ;;  %v1202_v52 = vld [vmem:[%s1429_s7 + $0x10] sm:$0xff] }
  0x40   :  { %588 = vmatpush.bf16.msrb.mxu3 %v1034_v23  ;;  %v1214_v23 = vld [vmem:[%s1429_s7 + $0x70] sm:$0xff] }
  0x41   :  { %613 = vmatpush.bf16.msra.mxu1 %v1046_v17  ;;  %600 = vmatpush.bf16.msra.mxu0 %v982_v42  ;;  %v1168_v17 = vld [vmem:[#allocation4 + $0x4] sm:$0xf] }
  0x42   :  { %v950_v20 = vor.u32 %v1168_v17, %v947_v19 }
  0x43   :  { %576 = vmatpush.bf16.msrb.mxu2 %v962_v0  ;;  %v407_v0 = vperm.slane %v405_v57, 0 }
  0x44   :  { %589 = vmatpush.bf16.msrb.mxu3 %v1026_v46  ;;  %v1205_v46 = vld [vmem:[%s1429_s7 + $0x28] sm:$0xff] }
  0x45   :  { %614 = vmatpush.bf16.msra.mxu1 %v1038_v26  ;;  %601 = vmatpush.bf16.msra.mxu0 %v974_v54  ;;  %v1213_v26 = vld [vmem:[%s1429_s7 + $0x68] sm:$0xff] }
  0x46   :  { %v1201_v54 = vld [vmem:[%s1429_s7 + $0x8] sm:$0xff] }
  0x47   :  { %577 = vmatpush.bf16.msrb.mxu2 %v954_v12  ;;  %v1220_v12 = vld [vmem:[%s1430_s8] ss:$0 sm:$0xff] }
  0x48   :  { %590 = vmatpush.bf16.msrb.mxu3 %v1018_v58  ;;  %v408_v58 = vperm.slane %v405_v57, 1 }
  0x49   :  { %615 = vmatpush.bf16.msra.mxu1 %v1030_v48  ;;  %602 = vmatpush.bf16.msra.mxu0 %v966_v2  ;;  %v1204_v48 = vld [vmem:[%s1429_s7 + $0x20] sm:$0xff] }
  0x4b   :  { %578 = vmatpush.bf16.msrb.mxu2 %v946_v18 }
  0x4c   :  { %591 = vmatpush.bf16.msrb.mxu3 %v1010_v6 }
  0x4d   :  { %616 = vmatpush.bf16.msra.mxu1 %v1022_v60  ;;  %603 = vmatpush.bf16.msra.mxu0 %v958_v14 }
  0x51   :  { %617 = vmatpush.bf16.msra.mxu1 %v1014_v8  ;;  %604 = vmatpush.bf16.msra.mxu0 %v950_v20 }
  0x91   :  { %v98_v27 = vpop.f32.mrf.mxu0 }
  0x92   :  { %v99_v29 = vadd.f32 %v98_v27, %v69_v24  ;;  %v1206_v24 = vld [vmem:[%s1429_s7 + $0x30] sm:$0xff] }
  0x93   :  { %v111_v28 = vpop.f32.mrf.mxu1 }
  0x94   :  { %v112_v30 = vadd.f32 %v111_v28, %v70_v25  ;;  %1221 = vtanh.f32 %v99_v29  ;;  %v151_v25 = vld [vmem:[%s1426_s4] sm:$0x3] }
  0x95   :  { %v154_v27 = vperm.slane %v151_v25, 1 }
  0x96   :  { %1223 = vtanh.f32 %v112_v30 }
  0x99   :  { %v100_v31 = vpop.f32.mrf.mxu0 }
  0x9a   :  { %v1222_v33 = vpop.eup %1221 }
  0x9b   :  { %v113_v32 = vpop.f32.mrf.mxu1  ;;  %v117_v35 = vpack.c.bf16 %v1222_v33, %v1222_v33 }
  0x9c   :  { %v1224_v34 = vpop.eup %1223  ;;  %v153_v32 = vperm.slane %v151_v25, 0 }
  0x9d   :  { %v118_v36 = vpack.c.bf16 %v1224_v34, %v1224_v34  ;;  %325 = vmatmul.bf16.vlgmr.msra.gmra.mxu2 %v117_v35  ;;  %351 = vmatmul.bf16.vlgmr.msrb.gmra.mxu0 %v117_v35 }
  0x9e   :  { %759 = vmatpush.bf16.msra.mxu2 %v1207_v22 }
  0x9f   :  { %338 = vmatmul.bf16.vlgmr.msra.gmra.mxu3 %v118_v36  ;;  %364 = vmatmul.bf16.vlgmr.msrb.gmra.mxu1 %v118_v36 }
  0xa0   :  { %772 = vmatpush.bf16.msra.mxu3 %v1215_v21 }
  0xa2   :  { %760 = vmatpush.bf16.msra.mxu2 %v1206_v24 }
  0xa4   :  { %773 = vmatpush.bf16.msra.mxu3 %v1214_v23 }
  0xa6   :  { %761 = vmatpush.bf16.msra.mxu2 %v1205_v46 }
  0xa8   :  { %774 = vmatpush.bf16.msra.mxu3 %v1213_v26 }
  0xaa   :  { %762 = vmatpush.bf16.msra.mxu2 %v1204_v48 }
  0xac   :  { %775 = vmatpush.bf16.msra.mxu3 %v1212_v45 }
  0xae   :  { %763 = vmatpush.bf16.msra.mxu2 %v1203_v50 }
  0xb0   :  { %776 = vmatpush.bf16.msra.mxu3 %v1211_v47 }
  0xb2   :  { %764 = vmatpush.bf16.msra.mxu2 %v1202_v52 }
  0xb4   :  { %777 = vmatpush.bf16.msra.mxu3 %v1210_v49 }
  0xb6   :  { %765 = vmatpush.bf16.msra.mxu2 %v1201_v54 }
  0xb8   :  { %778 = vmatpush.bf16.msra.mxu3 %v1209_v51 }
  0xba   :  { %766 = vmatpush.bf16.msra.mxu2 %v1200_v55 }
  0xbc   :  { %779 = vmatpush.bf16.msra.mxu3 %v1208_v53 }
 0x11a   :  { %v352_v28 = vpop.f32.mrf.mxu0 }
 0x11b   :  { %v353_v29 = vadd.f32 %v352_v28, %v154_v27 }
 0x11c   :  { %v365_v30 = vpop.f32.mrf.mxu1 }
 0x11d   :  { %v366_v31 = vadd.f32 %v365_v30, %v353_v29 }
 0x11f   :  { %1225 = vtanh.f32 %v366_v31 }
 0x120   :  { %v326_v33 = vpop.f32.mrf.mxu2 }
 0x121   :  { %v327_v34 = vadd.f32 %v326_v33, %v153_v32 }
 0x122   :  { %v339_v35 = vpop.f32.mrf.mxu3  ;;  %v354_v36 = vpop.f32.mrf.mxu0 }
 0x123   :  { %v340_v37 = vadd.f32 %v339_v35, %v327_v34 }
 0x124   :  { %v367_v38 = vpop.f32.mrf.mxu1 }
 0x125   :  { %v1226_v39 = vpop.eup %1225  ;;  %1227 = vtanh.f32 %v340_v37 }
 0x126   :  { %v372_v40 = vpack.c.bf16 %v1226_v39, %v1226_v39 }
 0x128   :  { %v328_v41 = vpop.f32.mrf.mxu2  ;;  %592 = vmatmul.bf16.vlgmr.msrb.gmra.mxu3 %v372_v40  ;;  %618 = vmatmul.bf16.vlgmr.msra.gmra.mxu1 %v372_v40 }
 0x12a   :  { %v341_v42 = vpop.f32.mrf.mxu3 }
 0x12b   :  { %v1228_v43 = vpop.eup %1227 }
 0x12c   :  { %v371_v44 = vpack.c.bf16 %v1228_v43, %v1228_v43 }
 0x12e   :  { %579 = vmatmul.bf16.vlgmr.msrb.gmra.mxu2 %v371_v44  ;;  %605 = vmatmul.bf16.vlgmr.msra.gmra.mxu0 %v371_v44 }
 0x1a5   :  { %v619_v56 = vpop.f32.mrf.mxu1 }
 0x1ab   :  { %v593_v59 = vpop.f32.mrf.mxu3  ;;  %v606_v60 = vpop.f32.mrf.mxu0 }
 0x1ac   :  { %v607_v61 = vadd.f32 %v606_v60, %v408_v58 }
 0x1ad   :  { %v621_v62 = vpop.f32.mrf.mxu1 }
 0x1ae   :  { %v620_v63 = vadd.f32 %v619_v56, %v607_v61 }
 0x1b0   :  { %1229 = vtanh.f32 %v620_v63 }
 0x1b1   :  { %v580_v1 = vpop.f32.mrf.mxu2 }
 0x1b2   :  { %v581_v2 = vadd.f32 %v580_v1, %v407_v0 }
 0x1b3   :  { %v595_v3 = vpop.f32.mrf.mxu3  ;;  %v608_v4 = vpop.f32.mrf.mxu0 }
 0x1b4   :  { %v594_v5 = vadd.f32 %v593_v59, %v581_v2 }
 0x1b6   :  { %v1230_v6 = vpop.eup %1229  ;;  %1231 = vtanh.f32 %v594_v5 }
 0x1b7   :  { %v626_v7 = vpack.c.bf16 %v1230_v6, %v1230_v6 }
 0x1b9   :  { %v582_v8 = vpop.f32.mrf.mxu2  ;;  %780 = vmatmul.bf16.vlgmr.msra.gmra.mxu3 %v626_v7 }
 0x1bc   :  { %v1232_v9 = vpop.eup %1231 }
 0x1bd   :  { %v625_v10 = vpack.c.bf16 %v1232_v9, %v1232_v9 }
 0x1bf   :  { %767 = vmatmul.bf16.vlgmr.msra.gmra.mxu2 %v625_v10 }
 0x23c   :  { %v781_v11 = vpop.f32.mrf.mxu3 }
 0x242   :  { %v768_v13 = vpop.f32.mrf.mxu2 }
 0x243   :  { %v769_v14 = vadd.f32 %v1220_v12, %v768_v13 }
 0x244   :  { %v783_v15 = vpop.f32.mrf.mxu3 }
 0x245   :  { %v782_v16 = vadd.f32 %v781_v11, %v769_v14 }
 0x247   :  { %v1135_v17 = vmul.f32 -1.442695, %v782_v16 }
 0x249   :  { %1233 = vpow2.f32 %v1135_v17 }
 0x24a   :  { %v770_v18 = vpop.f32.mrf.mxu2 }
 0x24f   :  { %v1234_v19 = vpop.eup %1233 }
 0x250   :  { %v788_v20 = vadd.f32 1.0, %v1234_v19 }
 0x252   :  { %1235 = vrcp.f32 %v788_v20  ;;  %v800_v24 = vand.u32 2147483648, %v788_v20  ;;  %v798_v26 = vand.u32 2147483647, %v788_v20  ;;  %vm794_vm3 = vweird.f32 %v788_v20 }
 0x254   :  { %v801_v28 = vor.u32 1.1754944e-38, %v800_v24  ;;  %vm799_vm5 = vcmp.eq.f32.partialorder %v798_v26, 8.507059e+37 }
 0x258   :  { %v1236_v21 = vpop.eup %1235 }
 0x259   :  { %v790_v22 = vmul.f32 %v1236_v21, %v788_v20  ;;  %vm795_vm2 = vweird.f32 %v1236_v21 }
 0x25a   :  { %vm796_vm4 = vmor %vm794_vm3, %vm795_vm2 }
 0x25b   :  { %v791_v23 = vsub.f32 1.0, %v790_v22 }
 0x25d   :  { %v792_v25 = vmul.f32 %v1236_v21, %v791_v23 }
 0x25f   :  { %v793_v27 = vadd.f32 %v1236_v21, %v792_v25 }
 0x261   :  { %v797_v29 = vsel %vm796_vm4, %v1236_v21, %v793_v27 }
 0x262   :  { %v802_v30 = vsel %vm799_vm5, %v801_v28, %v797_v29 }
 0x263   :  { %v804_v31 = vpack.c.bf16 %v802_v30, %v802_v30 }
 0x265   :  { %806 = vst.msk [vmem:[%s1431_s9] sm:$0xf] %vm805_vm6, %v804_v31 }
 0x266   :  { %811 = vsyncpa [#allocation3], 1 }
 0x267   :  { %812 = vsyncpa [#allocation5], 1 }

// kernel: gnn_layer_forward.3
= control target key start
LH: loop header
LB: loop body
LE: loop exit
PB: predicated region body
PF: predicated region fallthrough
CT: control target
= control target key end

     0   :  { %s1599_s0 = inlined_call_operand.vmem [shape: bf16[8,20], index: 0, kind: input, shape index: {}]   ;;  %s1600_s1 = inlined_call_operand.vmem [shape: bf16[20,256], index: 1, kind: input, shape index: {}]   ;;  %s1601_s2 = inlined_call_operand.vmem [shape: f32[1,256], index: 2, kind: input, shape index: {}]   ;;  %s1602_s3 = inlined_call_operand.vmem [shape: bf16[256,256], index: 3, kind: input, shape index: {}]   ;;  %s1603_s4 = inlined_call_operand.vmem [shape: f32[1,256], index: 4, kind: input, shape index: {}]   ;;  %s1604_s5 = inlined_call_operand.hbm [shape: bf16[256,256], index: 5, kind: input, shape index: {}]   ;;  %s1605_s6 = inlined_call_operand.vmem [shape: f32[1,256], index: 6, kind: input, shape index: {}]   ;;  %s1606_s7 = inlined_call_operand.vmem [shape: bf16[256,1], index: 7, kind: input, shape index: {}]   ;;  %s1607_s8 = inlined_call_operand.<no memory space> [shape: f32[1,1], index: 8, kind: input, shape index: {}]   ;;  %s1608_s9 = inlined_call_operand.vmem [shape: f32[8,1], index: 9, kind: output, shape index: {}]  }
   0x1   :  { %v14_v0 = vstv %s1607_s8 }
   0x2   :  { %15 = vst [vmem:[#allocation2] sm:$0x1] %v14_v0 }
   0x3   :  { %16 = vsyncpa [#allocation4], 0  ;;  %s31_s13 = sshll.u32 %s1604_s5, 4  ;;  %s1268_s14 = smov [#allocation3]   ;;  %s32_s13 = int_to_ptr.hbm [resolvable:$true] %s31_s13 }
   0x4   :  { %s33_s15 = sshll.u32 %s1268_s14, 4  ;;  %s1269_s16 = smov 128   ;;  %s34_s15 = int_to_ptr.vmem [resolvable:$true] %s33_s15 }
   0x5   :  { %s1270_s17 = smov 8  }
   0x6   :  { %39 = dma.hbm_to_vmem [thread:$0]  %s32_s13, 4096, %s34_s15, [#allocation4], %s1269_s16, %s1269_s16, %s1270_s17  }
   0x7   :  { %1266 = dma.done.wait [#allocation4], 4096  }
   0x8   :  { %1267 = vsyncadd [#allocation4], 4294963200  ;;  %v54_v1 = vld [vmem:[%s1600_s1 + $0x10] sm:$0x33]  ;;  %vm80_vm0 = vcmask 1041408   ;;  %vm76_vm1 = vcmask 162816  }
   0x9   :  { %v68_v2 = vunpack.c.l.b16 %v54_v1  ;;  %v69_v3 = vunpack.c.h.b16 %v54_v1  ;;  %v811_v4 = vld [vmem:[%s1600_s1] sm:$0xf]  ;;  %v1141_v5 = vld [vmem:[%s1600_s1 + $0x4] sm:$0xf0]  ;;  %v1140_v6 = vld [vmem:[%s1600_s1 + $0x4] sm:$0xf] }
   0xa   :  { %v813_v7 = vld [vmem:[%s1600_s1 + $0x8] sm:$0xf0]  ;;  %v877_v8 = vld [vmem:[%s1602_s3 + $0x70] sm:$0xf]  ;;  %v1157_v9 = vld [vmem:[%s1602_s3 + $0x74] sm:$0xf0]  ;;  %v812_v25 = vor.u32 %v1141_v5, %v811_v4 }
   0xb   :  { %v941_v10 = vld [vmem:[%s1602_s3 + $0xf0] sm:$0xf]  ;;  %v72_v11 = vpack.c.b16 %v68_v2, %v68_v2  ;;  %v73_v12 = vpack.c.b16 %v69_v3, %v69_v3  ;;  %v878_v13 = vor.u32 %v1157_v9, %v877_v8  ;;  %v1173_v14 = vld [vmem:[%s1602_s3 + $0xf4] sm:$0xf0]  ;;  %v1156_v15 = vld [vmem:[%s1602_s3 + $0x74] sm:$0xf]  ;;  %v816_v26 = vor.u32 %v1140_v6, %v813_v7 }
   0xc   :  { %v879_v16 = vld [vmem:[%s1602_s3 + $0x78] sm:$0xf0]  ;;  %v942_v17 = vor.u32 %v1173_v14, %v941_v10  ;;  %v1172_v18 = vld [vmem:[%s1602_s3 + $0xf4] sm:$0xf]  ;;  %v869_v20 = vld [vmem:[%s1602_s3 + $0x60] sm:$0xf] }
   0xd   :  { %v943_v19 = vld [vmem:[%s1602_s3 + $0xf8] sm:$0xf0]  ;;  %v82_v21 = vsel %vm80_vm0, %v72_v11, 0  ;;  %v85_v22 = vsel %vm80_vm0, %v73_v12, 0  ;;  %315 = vmatpush.bf16.msra.mxu2 %v878_v13  ;;  %v1155_v23 = vld [vmem:[%s1602_s3 + $0x64] sm:$0xf0]  ;;  %v882_v29 = vor.u32 %v1156_v15, %v879_v16 }
   0xe   :  { %v933_v24 = vld [vmem:[%s1602_s3 + $0xe0] sm:$0xf]  ;;  %93 = vmatpush.bf16.msra.mxu0 %v82_v21  ;;  %106 = vmatpush.bf16.msra.mxu1 %v85_v22  ;;  %v870_v27 = vor.u32 %v1155_v23, %v869_v20  ;;  %v1171_v28 = vld [vmem:[%s1602_s3 + $0xe4] sm:$0xf0]  ;;  %v946_v30 = vor.u32 %v1172_v18, %v943_v19  ;;  %v1154_v31 = vld [vmem:[%s1602_s3 + $0x64] sm:$0xf] }
   0xf   :  { %328 = vmatpush.bf16.msra.mxu3 %v942_v17  ;;  %v871_v32 = vld [vmem:[%s1602_s3 + $0x68] sm:$0xf0]  ;;  %v861_v33 = vld [vmem:[%s1602_s3 + $0x50] sm:$0xf]  ;;  %v934_v34 = vor.u32 %v1171_v28, %v933_v24  ;;  %v1170_v35 = vld [vmem:[%s1602_s3 + $0xe4] sm:$0xf] }
  0x10   :  { %v935_v36 = vld [vmem:[%s1602_s3 + $0xe8] sm:$0xf0]  ;;  %v1153_v37 = vld [vmem:[%s1602_s3 + $0x54] sm:$0xf0]  ;;  %v925_v38 = vld [vmem:[%s1602_s3 + $0xd0] sm:$0xf]  ;;  %v874_v42 = vor.u32 %v1154_v31, %v871_v32 }
  0x11   :  { %316 = vmatpush.bf16.msra.mxu2 %v870_v27  ;;  %v1169_v39 = vld [vmem:[%s1602_s3 + $0xd4] sm:$0xf0]  ;;  %v51_v40 = vld [vmem:[%s1599_s0] sm:$0xf]  ;;  %v862_v41 = vor.u32 %v1153_v37, %v861_v33  ;;  %v938_v43 = vor.u32 %v1170_v35, %v935_v36  ;;  %v1152_v44 = vld [vmem:[%s1602_s3 + $0x54] sm:$0xf] }
  0x12   :  { %94 = vmatpush.bf16.msra.mxu0 %v812_v25  ;;  %107 = vmatpush.bf16.msra.mxu1 %v816_v26  ;;  %v853_v45 = vld [vmem:[%s1602_s3 + $0x40] sm:$0xf]  ;;  %v1151_v46 = vld [vmem:[%s1602_s3 + $0x44] sm:$0xf0]  ;;  %v926_v47 = vor.u32 %v1169_v39, %v925_v38  ;;  %v863_v48 = vld [vmem:[%s1602_s3 + $0x58] sm:$0xf0] }
  0x13   :  { %329 = vmatpush.bf16.msra.mxu3 %v934_v34  ;;  %v1168_v49 = vld [vmem:[%s1602_s3 + $0xd4] sm:$0xf]  ;;  %v927_v50 = vld [vmem:[%s1602_s3 + $0xd8] sm:$0xf0]  ;;  %v917_v51 = vld [vmem:[%s1602_s3 + $0xc0] sm:$0xf]  ;;  %v854_v53 = vor.u32 %v1151_v46, %v853_v45  ;;  %v866_v55 = vor.u32 %v1152_v44, %v863_v48 }
  0x14   :  { %v1167_v52 = vld [vmem:[%s1602_s3 + $0xc4] sm:$0xf0]  ;;  %v1150_v54 = vld [vmem:[%s1602_s3 + $0x44] sm:$0xf]  ;;  %v930_v56 = vor.u32 %v1168_v49, %v927_v50  ;;  %v855_v57 = vld [vmem:[%s1602_s3 + $0x48] sm:$0xf0] }
  0x15   :  { %817 = vmatmul.msk.bf16.vlgmr.msra.gmra.mxu0 %vm76_vm1, %v51_v40  ;;  %818 = vmatmul.msk.bf16.vlgmr.msra.gmra.mxu1 %vm76_vm1, %v51_v40  ;;  %v845_v58 = vld [vmem:[%s1602_s3 + $0x30] sm:$0xf]  ;;  %v1149_v59 = vld [vmem:[%s1602_s3 + $0x34] sm:$0xf0]  ;;  %v918_v60 = vor.u32 %v1167_v52, %v917_v51  ;;  %v1166_v61 = vld [vmem:[%s1602_s3 + $0xc4] sm:$0xf]  ;;  %v858_v2 = vor.u32 %v1150_v54, %v855_v57 }
  0x16   :  { %341 = vmatpush.bf16.msrb.mxu0 %v882_v29  ;;  %354 = vmatpush.bf16.msrb.mxu1 %v946_v30  ;;  %v919_v62 = vld [vmem:[%s1602_s3 + $0xc8] sm:$0xf0]  ;;  %v909_v63 = vld [vmem:[%s1602_s3 + $0xb0] sm:$0xf]  ;;  %v1165_v0 = vld [vmem:[%s1602_s3 + $0xb4] sm:$0xf0]  ;;  %v846_v1 = vor.u32 %v1149_v59, %v845_v58 }
  0x17   :  { %317 = vmatpush.bf16.msra.mxu2 %v862_v41  ;;  %330 = vmatpush.bf16.msra.mxu3 %v926_v47  ;;  %v922_v3 = vor.u32 %v1166_v61, %v919_v62  ;;  %v1148_v4 = vld [vmem:[%s1602_s3 + $0x34] sm:$0xf]  ;;  %v910_v5 = vor.u32 %v1165_v0, %v909_v63  ;;  %v847_v6 = vld [vmem:[%s1602_s3 + $0x38] sm:$0xf0]  ;;  %v837_v11 = vld [vmem:[%s1602_s3 + $0x20] sm:$0xf] }
  0x18   :  { %v1164_v7 = vld [vmem:[%s1602_s3 + $0xb4] sm:$0xf]  ;;  %v911_v8 = vld [vmem:[%s1602_s3 + $0xb8] sm:$0xf0]  ;;  %v850_v9 = vor.u32 %v1148_v4, %v847_v6  ;;  %v1147_v12 = vld [vmem:[%s1602_s3 + $0x24] sm:$0xf0] }
  0x19   :  { %v914_v10 = vor.u32 %v1164_v7, %v911_v8  ;;  %v838_v13 = vor.u32 %v1147_v12, %v837_v11  ;;  %v901_v14 = vld [vmem:[%s1602_s3 + $0xa0] sm:$0xf]  ;;  %v1163_v15 = vld [vmem:[%s1602_s3 + $0xa4] sm:$0xf0]  ;;  %v1146_v16 = vld [vmem:[%s1602_s3 + $0x24] sm:$0xf] }
  0x1a   :  { %342 = vmatpush.bf16.msrb.mxu0 %v874_v42  ;;  %355 = vmatpush.bf16.msrb.mxu1 %v938_v43  ;;  %v902_v17 = vor.u32 %v1163_v15, %v901_v14  ;;  %v839_v18 = vld [vmem:[%s1602_s3 + $0x28] sm:$0xf0]  ;;  %v1162_v19 = vld [vmem:[%s1602_s3 + $0xa4] sm:$0xf]  ;;  %v829_v23 = vld [vmem:[%s1602_s3 + $0x10] sm:$0xf] }
  0x1b   :  { %318 = vmatpush.bf16.msra.mxu2 %v854_v53  ;;  %331 = vmatpush.bf16.msra.mxu3 %v918_v60  ;;  %v903_v20 = vld [vmem:[%s1602_s3 + $0xa8] sm:$0xf0]  ;;  %v842_v21 = vor.u32 %v1146_v16, %v839_v18  ;;  %v1145_v24 = vld [vmem:[%s1602_s3 + $0x14] sm:$0xf0]  ;;  %v893_v25 = vld [vmem:[%s1602_s3 + $0x90] sm:$0xf] }
  0x1c   :  { %v906_v22 = vor.u32 %v1162_v19, %v903_v20  ;;  %v830_v26 = vor.u32 %v1145_v24, %v829_v23  ;;  %v1161_v27 = vld [vmem:[%s1602_s3 + $0x94] sm:$0xf0]  ;;  %v1144_v28 = vld [vmem:[%s1602_s3 + $0x14] sm:$0xf]  ;;  %v831_v29 = vld [vmem:[%s1602_s3 + $0x18] sm:$0xf0] }
  0x1d   :  { %v894_v30 = vor.u32 %v1161_v27, %v893_v25  ;;  %v834_v31 = vor.u32 %v1144_v28, %v831_v29  ;;  %v1160_v32 = vld [vmem:[%s1602_s3 + $0x94] sm:$0xf]  ;;  %v895_v33 = vld [vmem:[%s1602_s3 + $0x98] sm:$0xf0]  ;;  %v821_v35 = vld [vmem:[%s1602_s3] sm:$0xf] }
  0x1e   :  { %343 = vmatpush.bf16.msrb.mxu0 %v866_v55  ;;  %356 = vmatpush.bf16.msrb.mxu1 %v930_v56  ;;  %v898_v34 = vor.u32 %v1160_v32, %v895_v33  ;;  %v1143_v36 = vld [vmem:[%s1602_s3 + $0x4] sm:$0xf0]  ;;  %v885_v37 = vld [vmem:[%s1602_s3 + $0x80] sm:$0xf]  ;;  %v1142_v40 = vld [vmem:[%s1602_s3 + $0x4] sm:$0xf] }
  0x1f   :  { %319 = vmatpush.bf16.msra.mxu2 %v846_v1  ;;  %332 = vmatpush.bf16.msra.mxu3 %v910_v5  ;;  %v822_v38 = vor.u32 %v1143_v36, %v821_v35  ;;  %v1159_v39 = vld [vmem:[%s1602_s3 + $0x84] sm:$0xf0]  ;;  %v823_v41 = vld [vmem:[%s1602_s3 + $0x8] sm:$0xf0]  ;;  %v1158_v44 = vld [vmem:[%s1602_s3 + $0x84] sm:$0xf] }
  0x20   :  { %v886_v42 = vor.u32 %v1159_v39, %v885_v37  ;;  %v826_v43 = vor.u32 %v1142_v40, %v823_v41  ;;  %v887_v45 = vld [vmem:[%s1602_s3 + $0x88] sm:$0xf0]  ;;  %v1069_v47 = vld [vmem:[#allocation3 + $0xf0] sm:$0xf]  ;;  %v1205_v48 = vld [vmem:[#allocation3 + $0xf4] sm:$0xf0] }
  0x21   :  { %v890_v46 = vor.u32 %v1158_v44, %v887_v45  ;;  %v1204_v49 = vld [vmem:[#allocation3 + $0xf4] sm:$0xf]  ;;  %v1070_v50 = vor.u32 %v1205_v48, %v1069_v47  ;;  %v1071_v51 = vld [vmem:[#allocation3 + $0xf8] sm:$0xf0]  ;;  %v1061_v52 = vld [vmem:[#allocation3 + $0xe0] sm:$0xf] }
  0x22   :  { %344 = vmatpush.bf16.msrb.mxu0 %v858_v2  ;;  %357 = vmatpush.bf16.msrb.mxu1 %v922_v3  ;;  %v1203_v53 = vld [vmem:[#allocation3 + $0xe4] sm:$0xf0]  ;;  %v1074_v54 = vor.u32 %v1204_v49, %v1071_v51  ;;  %v1202_v55 = vld [vmem:[#allocation3 + $0xe4] sm:$0xf]  ;;  %v1063_v56 = vld [vmem:[#allocation3 + $0xe8] sm:$0xf0] }
  0x23   :  { %320 = vmatpush.bf16.msra.mxu2 %v838_v13  ;;  %333 = vmatpush.bf16.msra.mxu3 %v902_v17  ;;  %v1005_v57 = vld [vmem:[#allocation3 + $0x70] sm:$0xf]  ;;  %v1062_v58 = vor.u32 %v1203_v53, %v1061_v52  ;;  %v1189_v59 = vld [vmem:[#allocation3 + $0x74] sm:$0xf0]  ;;  %v1188_v60 = vld [vmem:[#allocation3 + $0x74] sm:$0xf]  ;;  %v1066_v62 = vor.u32 %v1202_v55, %v1063_v56 }
  0x24   :  { %v1007_v61 = vld [vmem:[#allocation3 + $0x78] sm:$0xf0]  ;;  %v1006_v63 = vor.u32 %v1189_v59, %v1005_v57  ;;  %v1053_v1 = vld [vmem:[#allocation3 + $0xd0] sm:$0xf]  ;;  %v1201_v2 = vld [vmem:[#allocation3 + $0xd4] sm:$0xf0] }
  0x25   :  { %v1010_v0 = vor.u32 %v1188_v60, %v1007_v61  ;;  %v1200_v3 = vld [vmem:[#allocation3 + $0xd4] sm:$0xf]  ;;  %v1055_v4 = vld [vmem:[#allocation3 + $0xd8] sm:$0xf0]  ;;  %v997_v5 = vld [vmem:[#allocation3 + $0x60] sm:$0xf] }
  0x26   :  { %345 = vmatpush.bf16.msrb.mxu0 %v850_v9  ;;  %358 = vmatpush.bf16.msrb.mxu1 %v914_v10  ;;  %v1187_v6 = vld [vmem:[#allocation3 + $0x64] sm:$0xf0]  ;;  %v1186_v8 = vld [vmem:[#allocation3 + $0x64] sm:$0xf]  ;;  %v999_v9 = vld [vmem:[#allocation3 + $0x68] sm:$0xf0]  ;;  %v1054_v10 = vor.u32 %v1201_v2, %v1053_v1  ;;  %v1058_v14 = vor.u32 %v1200_v3, %v1055_v4 }
  0x27   :  { %321 = vmatpush.bf16.msra.mxu2 %v830_v26  ;;  %334 = vmatpush.bf16.msra.mxu3 %v894_v30  ;;  %v998_v7 = vor.u32 %v1187_v6, %v997_v5  ;;  %v1002_v11 = vor.u32 %v1186_v8, %v999_v9  ;;  %v1045_v12 = vld [vmem:[#allocation3 + $0xc0] sm:$0xf]  ;;  %v1199_v13 = vld [vmem:[#allocation3 + $0xc4] sm:$0xf0]  ;;  %v989_v15 = vld [vmem:[#allocation3 + $0x50] sm:$0xf] }
  0x28   :  { %v1185_v16 = vld [vmem:[#allocation3 + $0x54] sm:$0xf0]  ;;  %v1184_v17 = vld [vmem:[#allocation3 + $0x54] sm:$0xf]  ;;  %v1198_v18 = vld [vmem:[#allocation3 + $0xc4] sm:$0xf]  ;;  %v1046_v23 = vor.u32 %v1199_v13, %v1045_v12 }
  0x29   :  { %v1047_v19 = vld [vmem:[#allocation3 + $0xc8] sm:$0xf0]  ;;  %v991_v20 = vld [vmem:[#allocation3 + $0x58] sm:$0xf0]  ;;  %v1037_v25 = vld [vmem:[#allocation3 + $0xb0] sm:$0xf] }
  0x2a   :  { %346 = vmatpush.bf16.msrb.mxu0 %v842_v21  ;;  %359 = vmatpush.bf16.msrb.mxu1 %v906_v22  ;;  %v990_v21 = vor.u32 %v1185_v16, %v989_v15  ;;  %v994_v22 = vor.u32 %v1184_v17, %v991_v20  ;;  %v1050_v24 = vor.u32 %v1198_v18, %v1047_v19  ;;  %v1197_v26 = vld [vmem:[#allocation3 + $0xb4] sm:$0xf0]  ;;  %v55_v27 = vld [vmem:[%s1601_s2] sm:$0x3]  ;;  %v1196_v28 = vld [vmem:[#allocation3 + $0xb4] sm:$0xf] }
  0x2b   :  { %322 = vmatpush.bf16.msra.mxu2 %v822_v38  ;;  %335 = vmatpush.bf16.msra.mxu3 %v886_v42  ;;  %v1039_v29 = vld [vmem:[#allocation3 + $0xb8] sm:$0xf0]  ;;  %v1038_v30 = vor.u32 %v1197_v26, %v1037_v25  ;;  %v58_v32 = vperm.slane %v55_v27, 1  ;;  %v981_v44 = vld [vmem:[#allocation3 + $0x40] sm:$0xf]  ;;  %vm802_vm5 = vcmask 7168  }
  0x2c   :  { %v1042_v33 = vor.u32 %v1196_v28, %v1039_v29  ;;  %v1183_v45 = vld [vmem:[#allocation3 + $0x44] sm:$0xf0]  ;;  %v983_v48 = vld [vmem:[#allocation3 + $0x48] sm:$0xf0]  ;;  %v1194_v52 = vld [vmem:[#allocation3 + $0xa4] sm:$0xf] }
  0x2d   :  { %v982_v47 = vor.u32 %v1183_v45, %v981_v44  ;;  %v1195_v51 = vld [vmem:[#allocation3 + $0xa4] sm:$0xf0]  ;;  %v973_v56 = vld [vmem:[#allocation3 + $0x30] sm:$0xf]  ;;  %v1181_v57 = vld [vmem:[#allocation3 + $0x34] sm:$0xf0] }
  0x2e   :  { %347 = vmatpush.bf16.msrb.mxu0 %v834_v31  ;;  %360 = vmatpush.bf16.msrb.mxu1 %v898_v34  ;;  %v57_v31 = vperm.slane %v55_v27, 0  ;;  %v974_v59 = vor.u32 %v1181_v57, %v973_v56  ;;  %v975_v60 = vld [vmem:[#allocation3 + $0x38] sm:$0xf0]  ;;  %v965_v4 = vld [vmem:[#allocation3 + $0x20] sm:$0xf]  ;;  %v1216_v56 = vld [vmem:[%s1606_s7 + $0x50] sm:$0xff] }
  0x2f   :  { %582 = vmatpush.bf16.msrb.mxu3 %v1070_v50  ;;  %569 = vmatpush.bf16.msrb.mxu2 %v1006_v63  ;;  %v1029_v50 = vld [vmem:[#allocation3 + $0xa0] sm:$0xf]  ;;  %v1193_v63 = vld [vmem:[#allocation3 + $0x94] sm:$0xf0]  ;;  %v1023_v2 = vld [vmem:[#allocation3 + $0x98] sm:$0xf0] }
  0x30   :  { %v1030_v53 = vor.u32 %v1195_v51, %v1029_v50  ;;  %v1179_v5 = vld [vmem:[#allocation3 + $0x24] sm:$0xf0]  ;;  %v1178_v6 = vld [vmem:[#allocation3 + $0x24] sm:$0xf]  ;;  %v967_v8 = vld [vmem:[#allocation3 + $0x28] sm:$0xf0] }
  0x31   :  { %v970_v9 = vor.u32 %v1178_v6, %v967_v8  ;;  %v1190_v12 = vld [vmem:[#allocation3 + $0x84] sm:$0xf]  ;;  %v957_v16 = vld [vmem:[#allocation3 + $0x10] sm:$0xf]  ;;  %v1177_v17 = vld [vmem:[#allocation3 + $0x14] sm:$0xf0] }
  0x32   :  { %348 = vmatpush.bf16.msrb.mxu0 %v826_v43  ;;  %361 = vmatpush.bf16.msrb.mxu1 %v890_v46  ;;  %v1182_v46 = vld [vmem:[#allocation3 + $0x44] sm:$0xf]  ;;  %v1176_v18 = vld [vmem:[#allocation3 + $0x14] sm:$0xf]  ;;  %v958_v19 = vor.u32 %v1177_v17, %v957_v16  ;;  %v959_v20 = vld [vmem:[#allocation3 + $0x18] sm:$0xf0] }
  0x33   :  { %583 = vmatpush.bf16.msrb.mxu3 %v1062_v58  ;;  %570 = vmatpush.bf16.msrb.mxu2 %v998_v7  ;;  %v986_v49 = vor.u32 %v1182_v46, %v983_v48  ;;  %v1180_v58 = vld [vmem:[#allocation3 + $0x34] sm:$0xf]  ;;  %v966_v7 = vor.u32 %v1179_v5, %v965_v4  ;;  %v951_v26 = vld [vmem:[#allocation3 + $0x8] sm:$0xf0] }
  0x34   :  { %v978_v61 = vor.u32 %v1180_v58, %v975_v60  ;;  %v1221_v28 = vld [vmem:[%s1606_s7 + $0x78] sm:$0xff]  ;;  %v1215_v58 = vld [vmem:[%s1606_s7 + $0x48] sm:$0xff]  ;;  %v1214_v60 = vld [vmem:[%s1606_s7 + $0x40] sm:$0xff] }
  0x35   :  { %v1213_v29 = vld [vmem:[%s1606_s7 + $0x38] sm:$0xff] }
  0x36   :  { %608 = vmatpush.bf16.msra.mxu1 %v1074_v54  ;;  %595 = vmatpush.bf16.msra.mxu0 %v1010_v0  ;;  %v1031_v54 = vld [vmem:[#allocation3 + $0xa8] sm:$0xf0]  ;;  %v1192_v0 = vld [vmem:[#allocation3 + $0x94] sm:$0xf] }
  0x37   :  { %584 = vmatpush.bf16.msrb.mxu3 %v1054_v10  ;;  %571 = vmatpush.bf16.msrb.mxu2 %v990_v21  ;;  %v1034_v55 = vor.u32 %v1194_v52, %v1031_v54  ;;  %v1026_v3 = vor.u32 %v1192_v0, %v1023_v2  ;;  %v1013_v10 = vld [vmem:[#allocation3 + $0x80] sm:$0xf]  ;;  %v962_v21 = vor.u32 %v1176_v18, %v959_v20  ;;  %v1217_v54 = vld [vmem:[%s1606_s7 + $0x58] sm:$0xff] }
  0x38   :  { %v1218_v52 = vld [vmem:[%s1606_s7 + $0x60] sm:$0xff]  ;;  %v1209_v57 = vld [vmem:[%s1606_s7 + $0x18] sm:$0xff] }
  0x39   :  { %v403_v0 = vld [vmem:[%s1605_s6] sm:$0x3] }
  0x3a   :  { %609 = vmatpush.bf16.msra.mxu1 %v1066_v62  ;;  %596 = vmatpush.bf16.msra.mxu0 %v1002_v11  ;;  %v1021_v62 = vld [vmem:[#allocation3 + $0x90] sm:$0xf]  ;;  %v1191_v11 = vld [vmem:[#allocation3 + $0x84] sm:$0xf0] }
  0x3b   :  { %585 = vmatpush.bf16.msrb.mxu3 %v1046_v23  ;;  %572 = vmatpush.bf16.msrb.mxu2 %v982_v47  ;;  %v1022_v1 = vor.u32 %v1193_v63, %v1021_v62  ;;  %v1014_v13 = vor.u32 %v1191_v11, %v1013_v10  ;;  %v1175_v23 = vld [vmem:[#allocation3 + $0x4] sm:$0xf0]  ;;  %v1206_v62 = vld [vmem:[%s1606_s7] sm:$0xff] }
  0x3e   :  { %610 = vmatpush.bf16.msra.mxu1 %v1058_v14  ;;  %597 = vmatpush.bf16.msra.mxu0 %v994_v22  ;;  %v1015_v14 = vld [vmem:[#allocation3 + $0x88] sm:$0xf0]  ;;  %v949_v22 = vld [vmem:[#allocation3] sm:$0xf] }
  0x3f   :  { %586 = vmatpush.bf16.msrb.mxu3 %v1038_v30  ;;  %573 = vmatpush.bf16.msrb.mxu2 %v974_v59  ;;  %v1018_v15 = vor.u32 %v1190_v12, %v1015_v14  ;;  %v950_v25 = vor.u32 %v1175_v23, %v949_v22  ;;  %v1220_v30 = vld [vmem:[%s1606_s7 + $0x70] sm:$0xff] }
  0x40   :  { %v1208_v59 = vld [vmem:[%s1606_s7 + $0x10] sm:$0xff] }
  0x42   :  { %611 = vmatpush.bf16.msra.mxu1 %v1050_v24  ;;  %598 = vmatpush.bf16.msra.mxu0 %v986_v49  ;;  %v1174_v24 = vld [vmem:[#allocation3 + $0x4] sm:$0xf] }
  0x43   :  { %587 = vmatpush.bf16.msrb.mxu3 %v1030_v53  ;;  %574 = vmatpush.bf16.msrb.mxu2 %v966_v7  ;;  %v954_v27 = vor.u32 %v1174_v24, %v951_v26  ;;  %v1211_v53 = vld [vmem:[%s1606_s7 + $0x28] sm:$0xff]  ;;  %v405_v7 = vperm.slane %v403_v0, 0 }
  0x46   :  { %612 = vmatpush.bf16.msra.mxu1 %v1042_v33  ;;  %599 = vmatpush.bf16.msra.mxu0 %v978_v61  ;;  %v1219_v33 = vld [vmem:[%s1606_s7 + $0x68] sm:$0xff] }
  0x47   :  { %588 = vmatpush.bf16.msrb.mxu3 %v1022_v1  ;;  %575 = vmatpush.bf16.msrb.mxu2 %v958_v19  ;;  %v1207_v61 = vld [vmem:[%s1606_s7 + $0x8] sm:$0xff]  ;;  %v406_v1 = vperm.slane %v403_v0, 1  ;;  %v1225_v19 = vld [vmem:[#allocation2] ss:$0 sm:$0xff] }
  0x4a   :  { %613 = vmatpush.bf16.msra.mxu1 %v1034_v55  ;;  %600 = vmatpush.bf16.msra.mxu0 %v970_v9  ;;  %v1210_v55 = vld [vmem:[%s1606_s7 + $0x20] sm:$0xff] }
  0x4b   :  { %589 = vmatpush.bf16.msrb.mxu3 %v1014_v13  ;;  %576 = vmatpush.bf16.msrb.mxu2 %v950_v25 }
  0x4e   :  { %614 = vmatpush.bf16.msra.mxu1 %v1026_v3  ;;  %601 = vmatpush.bf16.msra.mxu0 %v962_v21 }
  0x52   :  { %615 = vmatpush.bf16.msra.mxu1 %v1018_v15  ;;  %602 = vmatpush.bf16.msra.mxu0 %v954_v27 }
  0x92   :  { %v96_v34 = vpop.f32.mrf.mxu0  ;;  %v109_v35 = vpop.f32.mrf.mxu1 }
  0x93   :  { %v97_v36 = vadd.f32 %v96_v34, %v57_v31  ;;  %v110_v37 = vadd.f32 %v109_v35, %v58_v32  ;;  %v1212_v31 = vld [vmem:[%s1606_s7 + $0x30] sm:$0xff]  ;;  %v149_v32 = vld [vmem:[%s1603_s4] sm:$0x3] }
  0x94   :  { %v152_v34 = vperm.slane %v149_v32, 1 }
  0x95   :  { %1226 = vtanh.f32 %v97_v36 }
  0x96   :  { %1228 = vtanh.f32 %v110_v37 }
  0x9a   :  { %v98_v38 = vpop.f32.mrf.mxu0  ;;  %v111_v39 = vpop.f32.mrf.mxu1 }
  0x9b   :  { %v1227_v40 = vpop.eup %1226  ;;  %v151_v39 = vperm.slane %v149_v32, 0 }
  0x9c   :  { %v1229_v41 = vpop.eup %1228  ;;  %v115_v42 = vpack.c.bf16 %v1227_v40, %v1227_v40 }
  0x9d   :  { %v116_v43 = vpack.c.bf16 %v1229_v41, %v1229_v41 }
  0x9e   :  { %323 = vmatmul.bf16.vlgmr.msra.gmra.mxu2 %v115_v42  ;;  %349 = vmatmul.bf16.vlgmr.msrb.gmra.mxu0 %v115_v42 }
  0x9f   :  { %336 = vmatmul.bf16.vlgmr.msra.gmra.mxu3 %v116_v43  ;;  %362 = vmatmul.bf16.vlgmr.msrb.gmra.mxu1 %v116_v43 }
  0xa0   :  { %770 = vmatpush.bf16.msra.mxu3 %v1221_v28  ;;  %757 = vmatpush.bf16.msra.mxu2 %v1213_v29 }
  0xa4   :  { %771 = vmatpush.bf16.msra.mxu3 %v1220_v30  ;;  %758 = vmatpush.bf16.msra.mxu2 %v1212_v31 }
  0xa8   :  { %772 = vmatpush.bf16.msra.mxu3 %v1219_v33  ;;  %759 = vmatpush.bf16.msra.mxu2 %v1211_v53 }
  0xac   :  { %773 = vmatpush.bf16.msra.mxu3 %v1218_v52  ;;  %760 = vmatpush.bf16.msra.mxu2 %v1210_v55 }
  0xb0   :  { %774 = vmatpush.bf16.msra.mxu3 %v1217_v54  ;;  %761 = vmatpush.bf16.msra.mxu2 %v1209_v57 }
  0xb4   :  { %775 = vmatpush.bf16.msra.mxu3 %v1216_v56  ;;  %762 = vmatpush.bf16.msra.mxu2 %v1208_v59 }
  0xb8   :  { %776 = vmatpush.bf16.msra.mxu3 %v1215_v58  ;;  %763 = vmatpush.bf16.msra.mxu2 %v1207_v61 }
  0xbc   :  { %777 = vmatpush.bf16.msra.mxu3 %v1214_v60  ;;  %764 = vmatpush.bf16.msra.mxu2 %v1206_v62 }
 0x11b   :  { %v350_v35 = vpop.f32.mrf.mxu0 }
 0x11c   :  { %v351_v36 = vadd.f32 %v350_v35, %v152_v34  ;;  %v363_v37 = vpop.f32.mrf.mxu1 }
 0x11e   :  { %v364_v38 = vadd.f32 %v363_v37, %v351_v36 }
 0x120   :  { %1230 = vtanh.f32 %v364_v38 }
 0x121   :  { %v324_v40 = vpop.f32.mrf.mxu2 }
 0x122   :  { %v325_v41 = vadd.f32 %v324_v40, %v151_v39  ;;  %v337_v42 = vpop.f32.mrf.mxu3 }
 0x123   :  { %v352_v43 = vpop.f32.mrf.mxu0 }
 0x124   :  { %v338_v44 = vadd.f32 %v337_v42, %v325_v41  ;;  %v365_v45 = vpop.f32.mrf.mxu1 }
 0x126   :  { %v1231_v46 = vpop.eup %1230  ;;  %1232 = vtanh.f32 %v338_v44 }
 0x127   :  { %v370_v47 = vpack.c.bf16 %v1231_v46, %v1231_v46 }
 0x129   :  { %v326_v48 = vpop.f32.mrf.mxu2  ;;  %590 = vmatmul.bf16.vlgmr.msrb.gmra.mxu3 %v370_v47  ;;  %616 = vmatmul.bf16.vlgmr.msra.gmra.mxu1 %v370_v47 }
 0x12a   :  { %v339_v49 = vpop.f32.mrf.mxu3 }
 0x12c   :  { %v1233_v50 = vpop.eup %1232 }
 0x12d   :  { %v369_v51 = vpack.c.bf16 %v1233_v50, %v1233_v50 }
 0x12f   :  { %577 = vmatmul.bf16.vlgmr.msrb.gmra.mxu2 %v369_v51  ;;  %603 = vmatmul.bf16.vlgmr.msra.gmra.mxu0 %v369_v51 }
 0x1a6   :  { %v617_v63 = vpop.f32.mrf.mxu1 }
 0x1ac   :  { %v591_v2 = vpop.f32.mrf.mxu3  ;;  %v604_v3 = vpop.f32.mrf.mxu0 }
 0x1ad   :  { %v605_v4 = vadd.f32 %v604_v3, %v406_v1 }
 0x1ae   :  { %v619_v5 = vpop.f32.mrf.mxu1 }
 0x1af   :  { %v618_v6 = vadd.f32 %v617_v63, %v605_v4 }
 0x1b1   :  { %1234 = vtanh.f32 %v618_v6 }
 0x1b2   :  { %v578_v8 = vpop.f32.mrf.mxu2 }
 0x1b3   :  { %v579_v9 = vadd.f32 %v578_v8, %v405_v7 }
 0x1b4   :  { %v593_v10 = vpop.f32.mrf.mxu3  ;;  %v606_v11 = vpop.f32.mrf.mxu0 }
 0x1b5   :  { %v592_v12 = vadd.f32 %v591_v2, %v579_v9 }
 0x1b7   :  { %v1235_v13 = vpop.eup %1234  ;;  %1236 = vtanh.f32 %v592_v12 }
 0x1b8   :  { %v624_v14 = vpack.c.bf16 %v1235_v13, %v1235_v13 }
 0x1ba   :  { %v580_v15 = vpop.f32.mrf.mxu2  ;;  %778 = vmatmul.bf16.vlgmr.msra.gmra.mxu3 %v624_v14 }
 0x1bd   :  { %v1237_v16 = vpop.eup %1236 }
 0x1be   :  { %v623_v17 = vpack.c.bf16 %v1237_v16, %v1237_v16 }
 0x1c0   :  { %765 = vmatmul.bf16.vlgmr.msra.gmra.mxu2 %v623_v17 }
 0x23d   :  { %v779_v18 = vpop.f32.mrf.mxu3 }
 0x243   :  { %v766_v20 = vpop.f32.mrf.mxu2 }
 0x244   :  { %v767_v21 = vadd.f32 %v1225_v19, %v766_v20 }
 0x245   :  { %v781_v22 = vpop.f32.mrf.mxu3 }
 0x246   :  { %v780_v23 = vadd.f32 %v779_v18, %v767_v21 }
 0x248   :  { %v1139_v24 = vmul.f32 -1.442695, %v780_v23 }
 0x24a   :  { %1238 = vpow2.f32 %v1139_v24 }
 0x24b   :  { %v768_v25 = vpop.f32.mrf.mxu2 }
 0x250   :  { %v1239_v26 = vpop.eup %1238 }
 0x251   :  { %v786_v27 = vadd.f32 1.0, %v1239_v26 }
 0x253   :  { %1240 = vrcp.f32 %v786_v27  ;;  %v798_v31 = vand.u32 2147483648, %v786_v27  ;;  %v796_v33 = vand.u32 2147483647, %v786_v27  ;;  %vm792_vm3 = vweird.f32 %v786_v27 }
 0x255   :  { %v799_v35 = vor.u32 1.1754944e-38, %v798_v31  ;;  %vm797_vm6 = vcmp.eq.f32.partialorder %v796_v33, 8.507059e+37 }
 0x259   :  { %v1241_v28 = vpop.eup %1240 }
 0x25a   :  { %v788_v29 = vmul.f32 %v1241_v28, %v786_v27  ;;  %vm793_vm2 = vweird.f32 %v1241_v28 }
 0x25b   :  { %vm794_vm4 = vmor %vm792_vm3, %vm793_vm2 }
 0x25c   :  { %v789_v30 = vsub.f32 1.0, %v788_v29 }
 0x25e   :  { %v790_v32 = vmul.f32 %v1241_v28, %v789_v30 }
 0x260   :  { %v791_v34 = vadd.f32 %v1241_v28, %v790_v32 }
 0x262   :  { %v795_v36 = vsel %vm794_vm4, %v1241_v28, %v791_v34 }
 0x263   :  { %v800_v37 = vsel %vm797_vm6, %v799_v35, %v795_v36 }
 0x264   :  { %803 = vst.msk [vmem:[%s1608_s9] sm:$0xff] %vm802_vm5, %v800_v37 }
 0x265   :  { %808 = vsyncpa [#allocation4], 1 }

</bundles_post_ra>
